<compile_context>
chip_gen: v6e
topology: v6e:2x2x1
jax: 0.10.0
libtpu: 0.0.40
codegen_flags: <defaults>
</compile_context>

<pallas_src>
import functools

import jax
import jax.numpy as jnp
import numpy as np
from jax.experimental import pallas as pl
from jax.experimental.pallas import tpu as pltpu

# ---------------- model hyperparameters (small, deterministic) --------------
EMBED_SIZE = 32     # E
HIDDEN_SIZE = 32    # H
VOCAB_SIZE = 128    # V
NUM_LAYERS = 2
MAX_SEQ_LENGTH = 8  # T
BATCH = 8           # B


def _lstm_cell(x, h, c, w_ih, w_hh, b, hidden):
    """One PyTorch-semantics LSTM cell step (reference only). Gates: i,f,g,o."""
    gates = (
        jnp.dot(x, w_ih, preferred_element_type=jnp.float32)
        + jnp.dot(h, w_hh, preferred_element_type=jnp.float32)
        + b
    )
    i = jax.nn.sigmoid(gates[:, 0 * hidden:1 * hidden])
    f = jax.nn.sigmoid(gates[:, 1 * hidden:2 * hidden])
    g = jnp.tanh(gates[:, 2 * hidden:3 * hidden])
    o = jax.nn.sigmoid(gates[:, 3 * hidden:4 * hidden])
    c_new = f * c + i * g
    h_new = o * jnp.tanh(c_new)
    return h_new, c_new


def decoder_kernel(x_ref, wih0_ref, b0_ref, whh0_ref, w1_ref, b1_ref,
                   wout_ref, bout_ref, out_ref, *, steps, batch, hidden):
    """Single-invocation kernel: whole recurrence + output projection.

    x_ref   : (steps*B, E)  time-major embedded inputs (rows grouped by t)
    wih0_ref: (E, 4H)       layer-0 input weights
    b0_ref  : (1, 4H)       layer-0 bias with pos-enc pre-folded
    whh0_ref: (H, 4H)       layer-0 recurrent weights
    w1_ref  : (2H, 4H)      fused layer-1 [W_ih1; W_hh1]
    b1_ref  : (1, 4H)
    wout_ref: (H, V), bout_ref: (1, V)
    out_ref : (steps*B, V)  logits, rows grouped by t
    """
    B, H = batch, hidden

    # ---- hoisted off the recurrent path: batched layer-0 input projection ---
    xproj = jnp.dot(x_ref[...], wih0_ref[...],
                    preferred_element_type=jnp.float32) + b0_ref[...]  # (steps*B, 4H)

    whh0 = whh0_ref[...]
    w1 = w1_ref[...]
    b1 = jnp.broadcast_to(b1_ref[...], (B, 4 * H))      # broadcast hoisted out of loop

    h0 = jnp.zeros((B, H), jnp.float32)
    c0 = jnp.zeros((B, H), jnp.float32)
    h1 = jnp.zeros((B, H), jnp.float32)
    c1 = jnp.zeros((B, H), jnp.float32)

    def cell(gates, c):
        # Apply nonlinearities to the full (B, 4H) vreg once, then slice.
        sig = jax.nn.sigmoid(gates)
        th = jnp.tanh(gates)
        i = sig[:, 0 * H:1 * H]
        f = sig[:, 1 * H:2 * H]
        g = th[:, 2 * H:3 * H]
        o = sig[:, 3 * H:4 * H]
        c_new = f * c + i * g
        h_new = o * jnp.tanh(c_new)
        return h_new, c_new

    h1_steps = []
    for t in range(steps):                               # static unroll (7 steps)
        # Layer 0: input projection precomputed; only the recurrent matmul here.
        g0 = xproj[t * B:(t + 1) * B, :] + jnp.dot(
            h0, whh0, preferred_element_type=jnp.float32)
        h0, c0 = cell(g0, c0)

        # Layer 1: fused input/recurrent matmul.
        xh = jnp.concatenate([h0, h1], axis=-1)          # (B, 2H)
        g1 = jnp.dot(xh, w1, preferred_element_type=jnp.float32) + b1
        h1, c1 = cell(g1, c1)
        h1_steps.append(h1)

    # ---- deferred output Linear: one (steps*B, H) @ (H, V) matmul -----------
    h1_all = jnp.concatenate(h1_steps, axis=0)           # (steps*B, H)
    logits = jnp.dot(h1_all, wout_ref[...],
                     preferred_element_type=jnp.float32) + bout_ref[...]
    out_ref[...] = logits.astype(out_ref.dtype)


def decoder_lstm_forward(params, captions):
    """Pallas implementation of DecoderLSTM.forward with teacher forcing = 1.0.

    captions: (B, T) int32 token ids.   Returns (B, T, V) float32 logits,
    with outputs[:, 0, :] == 0, matching the PyTorch loop that starts at t=1.
    """
    B, T = captions.shape
    E, H, V = EMBED_SIZE, HIDDEN_SIZE, VOCAB_SIZE
    steps = T - 1

    # Glue: embedding gather for teacher-forced inputs (tokens 0..T-2),
    # time-major and flattened to (steps*B, E) so rows group by timestep.
    tokens_in = captions[:, :steps]                        # (B, T-1)
    x_seq = params["embed"][tokens_in]                     # (B, T-1, E)
    x_seq = jnp.transpose(x_seq, (1, 0, 2)).reshape(steps * B, E)

    # Fold positional encoding into the layer-0 bias: (x+pe)@W = x@W + pe@W.
    pe = params["pos_enc"][0, 0:1, :]                      # (1, E)
    b0_eff = params["b0"] + pe @ params["w_ih0"]           # (1, 4H)

    # Pre-stack layer-1 weights for the fused [h0 | h1] matmul.
    w1 = jnp.concatenate([params["w_ih1"], params["w_hh1"]], axis=0)  # (2H, 4H)

    inputs = (x_seq, params["w_ih0"], b0_eff, params["w_hh0"],
              w1, params["b1"], params["w_out"], params["b_out"])

    def full_spec(a):
        return pl.BlockSpec(a.shape, lambda i: (0, 0))

    kernel = functools.partial(decoder_kernel, steps=steps, batch=B, hidden=H)

    out2d = pl.pallas_call(
        kernel,
        out_shape=jax.ShapeDtypeStruct((steps * B, V), jnp.float32),
        grid_spec=pltpu.PrefetchScalarGridSpec(
            num_scalar_prefetch=0,
            grid=(1,),
            in_specs=[full_spec(a) for a in inputs],
            out_specs=pl.BlockSpec((steps * B, V), lambda i: (0, 0)),
        ),
        compiler_params=pltpu.CompilerParams(
            dimension_semantics=("arbitrary",)),
    )(*inputs)

    # Back to (B, T, V); t=0 row is zero, exactly like the PyTorch forward.
    out = jnp.transpose(out2d.reshape(steps, B, V), (1, 0, 2))   # (B, T-1, V)
    zeros0 = jnp.zeros((B, 1, V), jnp.float32)
    return jnp.concatenate([zeros0, out], axis=1)                # (B, T, V)


def reference_forward(params, captions):
    """Pure-JAX reference mirroring the PyTorch loop (teacher forcing)."""
    B, T = captions.shape
    H, V = HIDDEN_SIZE, VOCAB_SIZE
    pe = params["pos_enc"][0, 0:1, :]
    h0 = jnp.zeros((B, H)); c0 = jnp.zeros((B, H))
    h1 = jnp.zeros((B, H)); c1 = jnp.zeros((B, H))
    outputs = [jnp.zeros((B, V), jnp.float32)]
    for t in range(1, T):
        x = params["embed"][captions[:, t - 1]] + pe
        h0, c0 = _lstm_cell(x, h0, c0, params["w_ih0"], params["w_hh0"],
                            params["b0"], H)
        h1, c1 = _lstm_cell(h0, h1, c1, params["w_ih1"], params["w_hh1"],
                            params["b1"], H)
        outputs.append(h1 @ params["w_out"] + params["b_out"][0])
    return jnp.stack(outputs, axis=1)


def init_params(key):
    E, H, V, T = EMBED_SIZE, HIDDEN_SIZE, VOCAB_SIZE, MAX_SEQ_LENGTH
    ks = jax.random.split(key, 12)
    s = 0.1
    return {
        "embed":   s * jax.random.normal(ks[0], (V, E), jnp.float32),
        "pos_enc": s * jax.random.normal(ks[1], (1, T, E), jnp.float32),
        # Layer 0: input E -> 4H   (stored pre-transposed: (in, 4H))
        "w_ih0":   s * jax.random.normal(ks[2], (E, 4 * H), jnp.float32),
        "w_hh0":   s * jax.random.normal(ks[3], (H, 4 * H), jnp.float32),
        "b0":      s * jax.random.normal(ks[4], (1, 4 * H), jnp.float32),
        # Layer 1: input H -> 4H
        "w_ih1":   s * jax.random.normal(ks[5], (H, 4 * H), jnp.float32),
        "w_hh1":   s * jax.random.normal(ks[6], (H, 4 * H), jnp.float32),
        "b1":      s * jax.random.normal(ks[7], (1, 4 * H), jnp.float32),
        # Output Linear: H -> V
        "w_out":   s * jax.random.normal(ks[8], (H, V), jnp.float32),
        "b_out":   s * jax.random.normal(ks[9], (1, V), jnp.float32),
    }


if __name__ == "__main__":
    key = jax.random.PRNGKey(0)
    pkey, ckey, fkey = jax.random.split(key, 3)

    params = init_params(pkey)
    captions = jax.random.randint(
        ckey, (BATCH, MAX_SEQ_LENGTH), 0, VOCAB_SIZE, dtype=jnp.int32)
    # `features` is accepted but unused by the PyTorch forward.
    features = jax.random.normal(fkey, (BATCH, EMBED_SIZE), jnp.float32)

    out = decoder_lstm_forward(params, captions)
    out = jax.block_until_ready(out)

    ref = reference_forward(params, captions)
    np.testing.assert_allclose(np.asarray(out), np.asarray(ref),
                               rtol=1e-3, atol=1e-3)

    assert out.shape == (BATCH, MAX_SEQ_LENGTH, VOCAB_SIZE)
    print("KERNEL_OK")
</pallas_src>

<mosaic_0001>
module attributes {stable_mosaic.version = 11 : i64} {
  func.func @decoder_kernel(%arg0: i32, %arg1: memref<56x32xf32, #tpu.memory_space<vmem>>, %arg2: memref<32x128xf32, #tpu.memory_space<vmem>>, %arg3: memref<1x128xf32, #tpu.memory_space<vmem>>, %arg4: memref<32x128xf32, #tpu.memory_space<vmem>>, %arg5: memref<64x128xf32, #tpu.memory_space<vmem>>, %arg6: memref<1x128xf32, #tpu.memory_space<vmem>>, %arg7: memref<32x128xf32, #tpu.memory_space<vmem>>, %arg8: memref<1x128xf32, #tpu.memory_space<vmem>>, %arg9: memref<56x128xf32, #tpu.memory_space<vmem>>) attributes {dimension_semantics = [#tpu.dimension_semantics<arbitrary>], iteration_bounds = array<i64: 1>, scalar_prefetch = 0 : i64, scratch_operands = 0 : i64, tpu.core_type = #tpu.core_type<tc>, window_params = [{pipeline_mode = #tpu.pipeline_mode<synchronous>, transform_indices = @transform_0, window_bounds = array<i64: 56, 32>}, {pipeline_mode = #tpu.pipeline_mode<synchronous>, transform_indices = @transform_1, window_bounds = array<i64: 32, 128>}, {pipeline_mode = #tpu.pipeline_mode<synchronous>, transform_indices = @transform_2, window_bounds = array<i64: 1, 128>}, {pipeline_mode = #tpu.pipeline_mode<synchronous>, transform_indices = @transform_3, window_bounds = array<i64: 32, 128>}, {pipeline_mode = #tpu.pipeline_mode<synchronous>, transform_indices = @transform_4, window_bounds = array<i64: 64, 128>}, {pipeline_mode = #tpu.pipeline_mode<synchronous>, transform_indices = @transform_5, window_bounds = array<i64: 1, 128>}, {pipeline_mode = #tpu.pipeline_mode<synchronous>, transform_indices = @transform_6, window_bounds = array<i64: 32, 128>}, {pipeline_mode = #tpu.pipeline_mode<synchronous>, transform_indices = @transform_7, window_bounds = array<i64: 1, 128>}, {pipeline_mode = #tpu.pipeline_mode<synchronous>, transform_indices = @transform_8, window_bounds = array<i64: 56, 128>}]} {
    %c0 = arith.constant 0 : index
    %c0_0 = arith.constant 0 : index
    %0 = vector.load %arg1[%c0, %c0_0] : memref<56x32xf32, #tpu.memory_space<vmem>>, vector<56x32xf32>
    %c0_1 = arith.constant 0 : index
    %c0_2 = arith.constant 0 : index
    %1 = vector.load %arg2[%c0_1, %c0_2] : memref<32x128xf32, #tpu.memory_space<vmem>>, vector<32x128xf32>
    %cst = arith.constant dense<0.000000e+00> : vector<56x128xf32>
    %2 = tpu.matmul %0, %1, %cst {dimension_numbers = #tpu.dot_dimension_numbers<[1], [0], [0], [1], [0, 0, 1, 1], [], []>} : vector<56x32xf32>, vector<32x128xf32>, vector<56x128xf32> -> vector<56x128xf32>
    %c0_3 = arith.constant 0 : index
    %c0_4 = arith.constant 0 : index
    %3 = vector.load %arg3[%c0_3, %c0_4] : memref<1x128xf32, #tpu.memory_space<vmem>>, vector<1x128xf32>
    %4 = vector.broadcast %3 : vector<1x128xf32> to vector<56x128xf32>
    %5 = arith.addf %2, %4 : vector<56x128xf32>
    %c0_5 = arith.constant 0 : index
    %c0_6 = arith.constant 0 : index
    %6 = vector.load %arg4[%c0_5, %c0_6] : memref<32x128xf32, #tpu.memory_space<vmem>>, vector<32x128xf32>
    %c0_7 = arith.constant 0 : index
    %c0_8 = arith.constant 0 : index
    %7 = vector.load %arg5[%c0_7, %c0_8] : memref<64x128xf32, #tpu.memory_space<vmem>>, vector<64x128xf32>
    %c0_9 = arith.constant 0 : index
    %c0_10 = arith.constant 0 : index
    %8 = vector.load %arg6[%c0_9, %c0_10] : memref<1x128xf32, #tpu.memory_space<vmem>>, vector<1x128xf32>
    %9 = vector.shape_cast %8 : vector<1x128xf32> to vector<1x128xf32>
    %10 = vector.broadcast %9 : vector<1x128xf32> to vector<8x128xf32>
    %cst_11 = arith.constant 0.000000e+00 : f32
    %11 = vector.broadcast %cst_11 : f32 to vector<8x32xf32>
    %cst_12 = arith.constant 0.000000e+00 : f32
    %12 = vector.broadcast %cst_12 : f32 to vector<8x32xf32>
    %cst_13 = arith.constant 0.000000e+00 : f32
    %13 = vector.broadcast %cst_13 : f32 to vector<8x32xf32>
    %cst_14 = arith.constant 0.000000e+00 : f32
    %14 = vector.broadcast %cst_14 : f32 to vector<8x32xf32>
    %15 = vector.extract_strided_slice %5 {offsets = [0, 0], sizes = [8, 128], strides = [1, 1]} : vector<56x128xf32> to vector<8x128xf32>
    %cst_15 = arith.constant dense<0.000000e+00> : vector<8x128xf32>
    %16 = tpu.matmul %11, %6, %cst_15 {dimension_numbers = #tpu.dot_dimension_numbers<[1], [0], [0], [1], [0, 0, 1, 1], [], []>} : vector<8x32xf32>, vector<32x128xf32>, vector<8x128xf32> -> vector<8x128xf32>
    %17 = arith.addf %15, %16 : vector<8x128xf32>
    %18 = arith.negf %17 : vector<8x128xf32>
    %19 = math.exp %18 : vector<8x128xf32>
    %cst_16 = arith.constant 1.000000e+00 : f32
    %20 = vector.broadcast %cst_16 : f32 to vector<8x128xf32>
    %21 = arith.addf %20, %19 : vector<8x128xf32>
    %22 = arith.divf %20, %21 : vector<8x128xf32>
    %23 = math.tanh %17 : vector<8x128xf32>
    %24 = vector.extract_strided_slice %22 {offsets = [0, 0], sizes = [8, 32], strides = [1, 1]} : vector<8x128xf32> to vector<8x32xf32>
    %25 = vector.extract_strided_slice %22 {offsets = [0, 32], sizes = [8, 32], strides = [1, 1]} : vector<8x128xf32> to vector<8x32xf32>
    %26 = vector.extract_strided_slice %23 {offsets = [0, 64], sizes = [8, 32], strides = [1, 1]} : vector<8x128xf32> to vector<8x32xf32>
    %27 = vector.extract_strided_slice %22 {offsets = [0, 96], sizes = [8, 32], strides = [1, 1]} : vector<8x128xf32> to vector<8x32xf32>
    %28 = arith.mulf %25, %12 : vector<8x32xf32>
    %29 = arith.mulf %24, %26 : vector<8x32xf32>
    %30 = arith.addf %28, %29 : vector<8x32xf32>
    %31 = math.tanh %30 : vector<8x32xf32>
    %32 = arith.mulf %27, %31 : vector<8x32xf32>
    %33 = tpu.concatenate %32, %13 in 1 : vector<8x32xf32>, vector<8x32xf32> -> vector<8x64xf32>
    %cst_17 = arith.constant dense<0.000000e+00> : vector<8x128xf32>
    %34 = tpu.matmul %33, %7, %cst_17 {dimension_numbers = #tpu.dot_dimension_numbers<[1], [0], [0], [1], [0, 0, 1, 1], [], []>} : vector<8x64xf32>, vector<64x128xf32>, vector<8x128xf32> -> vector<8x128xf32>
    %35 = arith.addf %34, %10 : vector<8x128xf32>
    %36 = arith.negf %35 : vector<8x128xf32>
    %37 = math.exp %36 : vector<8x128xf32>
    %cst_18 = arith.constant 1.000000e+00 : f32
    %38 = vector.broadcast %cst_18 : f32 to vector<8x128xf32>
    %39 = arith.addf %38, %37 : vector<8x128xf32>
    %40 = arith.divf %38, %39 : vector<8x128xf32>
    %41 = math.tanh %35 : vector<8x128xf32>
    %42 = vector.extract_strided_slice %40 {offsets = [0, 0], sizes = [8, 32], strides = [1, 1]} : vector<8x128xf32> to vector<8x32xf32>
    %43 = vector.extract_strided_slice %40 {offsets = [0, 32], sizes = [8, 32], strides = [1, 1]} : vector<8x128xf32> to vector<8x32xf32>
    %44 = vector.extract_strided_slice %41 {offsets = [0, 64], sizes = [8, 32], strides = [1, 1]} : vector<8x128xf32> to vector<8x32xf32>
    %45 = vector.extract_strided_slice %40 {offsets = [0, 96], sizes = [8, 32], strides = [1, 1]} : vector<8x128xf32> to vector<8x32xf32>
    %46 = arith.mulf %43, %14 : vector<8x32xf32>
    %47 = arith.mulf %42, %44 : vector<8x32xf32>
    %48 = arith.addf %46, %47 : vector<8x32xf32>
    %49 = math.tanh %48 : vector<8x32xf32>
    %50 = arith.mulf %45, %49 : vector<8x32xf32>
    %51 = vector.extract_strided_slice %5 {offsets = [8, 0], sizes = [8, 128], strides = [1, 1]} : vector<56x128xf32> to vector<8x128xf32>
    %cst_19 = arith.constant dense<0.000000e+00> : vector<8x128xf32>
    %52 = tpu.matmul %32, %6, %cst_19 {dimension_numbers = #tpu.dot_dimension_numbers<[1], [0], [0], [1], [0, 0, 1, 1], [], []>} : vector<8x32xf32>, vector<32x128xf32>, vector<8x128xf32> -> vector<8x128xf32>
    %53 = arith.addf %51, %52 : vector<8x128xf32>
    %54 = arith.negf %53 : vector<8x128xf32>
    %55 = math.exp %54 : vector<8x128xf32>
    %cst_20 = arith.constant 1.000000e+00 : f32
    %56 = vector.broadcast %cst_20 : f32 to vector<8x128xf32>
    %57 = arith.addf %56, %55 : vector<8x128xf32>
    %58 = arith.divf %56, %57 : vector<8x128xf32>
    %59 = math.tanh %53 : vector<8x128xf32>
    %60 = vector.extract_strided_slice %58 {offsets = [0, 0], sizes = [8, 32], strides = [1, 1]} : vector<8x128xf32> to vector<8x32xf32>
    %61 = vector.extract_strided_slice %58 {offsets = [0, 32], sizes = [8, 32], strides = [1, 1]} : vector<8x128xf32> to vector<8x32xf32>
    %62 = vector.extract_strided_slice %59 {offsets = [0, 64], sizes = [8, 32], strides = [1, 1]} : vector<8x128xf32> to vector<8x32xf32>
    %63 = vector.extract_strided_slice %58 {offsets = [0, 96], sizes = [8, 32], strides = [1, 1]} : vector<8x128xf32> to vector<8x32xf32>
    %64 = arith.mulf %61, %30 : vector<8x32xf32>
    %65 = arith.mulf %60, %62 : vector<8x32xf32>
    %66 = arith.addf %64, %65 : vector<8x32xf32>
    %67 = math.tanh %66 : vector<8x32xf32>
    %68 = arith.mulf %63, %67 : vector<8x32xf32>
    %69 = tpu.concatenate %68, %50 in 1 : vector<8x32xf32>, vector<8x32xf32> -> vector<8x64xf32>
    %cst_21 = arith.constant dense<0.000000e+00> : vector<8x128xf32>
    %70 = tpu.matmul %69, %7, %cst_21 {dimension_numbers = #tpu.dot_dimension_numbers<[1], [0], [0], [1], [0, 0, 1, 1], [], []>} : vector<8x64xf32>, vector<64x128xf32>, vector<8x128xf32> -> vector<8x128xf32>
    %71 = arith.addf %70, %10 : vector<8x128xf32>
    %72 = arith.negf %71 : vector<8x128xf32>
    %73 = math.exp %72 : vector<8x128xf32>
    %cst_22 = arith.constant 1.000000e+00 : f32
    %74 = vector.broadcast %cst_22 : f32 to vector<8x128xf32>
    %75 = arith.addf %74, %73 : vector<8x128xf32>
    %76 = arith.divf %74, %75 : vector<8x128xf32>
    %77 = math.tanh %71 : vector<8x128xf32>
    %78 = vector.extract_strided_slice %76 {offsets = [0, 0], sizes = [8, 32], strides = [1, 1]} : vector<8x128xf32> to vector<8x32xf32>
    %79 = vector.extract_strided_slice %76 {offsets = [0, 32], sizes = [8, 32], strides = [1, 1]} : vector<8x128xf32> to vector<8x32xf32>
    %80 = vector.extract_strided_slice %77 {offsets = [0, 64], sizes = [8, 32], strides = [1, 1]} : vector<8x128xf32> to vector<8x32xf32>
    %81 = vector.extract_strided_slice %76 {offsets = [0, 96], sizes = [8, 32], strides = [1, 1]} : vector<8x128xf32> to vector<8x32xf32>
    %82 = arith.mulf %79, %48 : vector<8x32xf32>
    %83 = arith.mulf %78, %80 : vector<8x32xf32>
    %84 = arith.addf %82, %83 : vector<8x32xf32>
    %85 = math.tanh %84 : vector<8x32xf32>
    %86 = arith.mulf %81, %85 : vector<8x32xf32>
    %87 = vector.extract_strided_slice %5 {offsets = [16, 0], sizes = [8, 128], strides = [1, 1]} : vector<56x128xf32> to vector<8x128xf32>
    %cst_23 = arith.constant dense<0.000000e+00> : vector<8x128xf32>
    %88 = tpu.matmul %68, %6, %cst_23 {dimension_numbers = #tpu.dot_dimension_numbers<[1], [0], [0], [1], [0, 0, 1, 1], [], []>} : vector<8x32xf32>, vector<32x128xf32>, vector<8x128xf32> -> vector<8x128xf32>
    %89 = arith.addf %87, %88 : vector<8x128xf32>
    %90 = arith.negf %89 : vector<8x128xf32>
    %91 = math.exp %90 : vector<8x128xf32>
    %cst_24 = arith.constant 1.000000e+00 : f32
    %92 = vector.broadcast %cst_24 : f32 to vector<8x128xf32>
    %93 = arith.addf %92, %91 : vector<8x128xf32>
    %94 = arith.divf %92, %93 : vector<8x128xf32>
    %95 = math.tanh %89 : vector<8x128xf32>
    %96 = vector.extract_strided_slice %94 {offsets = [0, 0], sizes = [8, 32], strides = [1, 1]} : vector<8x128xf32> to vector<8x32xf32>
    %97 = vector.extract_strided_slice %94 {offsets = [0, 32], sizes = [8, 32], strides = [1, 1]} : vector<8x128xf32> to vector<8x32xf32>
    %98 = vector.extract_strided_slice %95 {offsets = [0, 64], sizes = [8, 32], strides = [1, 1]} : vector<8x128xf32> to vector<8x32xf32>
    %99 = vector.extract_strided_slice %94 {offsets = [0, 96], sizes = [8, 32], strides = [1, 1]} : vector<8x128xf32> to vector<8x32xf32>
    %100 = arith.mulf %97, %66 : vector<8x32xf32>
    %101 = arith.mulf %96, %98 : vector<8x32xf32>
    %102 = arith.addf %100, %101 : vector<8x32xf32>
    %103 = math.tanh %102 : vector<8x32xf32>
    %104 = arith.mulf %99, %103 : vector<8x32xf32>
    %105 = tpu.concatenate %104, %86 in 1 : vector<8x32xf32>, vector<8x32xf32> -> vector<8x64xf32>
    %cst_25 = arith.constant dense<0.000000e+00> : vector<8x128xf32>
    %106 = tpu.matmul %105, %7, %cst_25 {dimension_numbers = #tpu.dot_dimension_numbers<[1], [0], [0], [1], [0, 0, 1, 1], [], []>} : vector<8x64xf32>, vector<64x128xf32>, vector<8x128xf32> -> vector<8x128xf32>
    %107 = arith.addf %106, %10 : vector<8x128xf32>
    %108 = arith.negf %107 : vector<8x128xf32>
    %109 = math.exp %108 : vector<8x128xf32>
    %cst_26 = arith.constant 1.000000e+00 : f32
    %110 = vector.broadcast %cst_26 : f32 to vector<8x128xf32>
    %111 = arith.addf %110, %109 : vector<8x128xf32>
    %112 = arith.divf %110, %111 : vector<8x128xf32>
    %113 = math.tanh %107 : vector<8x128xf32>
    %114 = vector.extract_strided_slice %112 {offsets = [0, 0], sizes = [8, 32], strides = [1, 1]} : vector<8x128xf32> to vector<8x32xf32>
    %115 = vector.extract_strided_slice %112 {offsets = [0, 32], sizes = [8, 32], strides = [1, 1]} : vector<8x128xf32> to vector<8x32xf32>
    %116 = vector.extract_strided_slice %113 {offsets = [0, 64], sizes = [8, 32], strides = [1, 1]} : vector<8x128xf32> to vector<8x32xf32>
    %117 = vector.extract_strided_slice %112 {offsets = [0, 96], sizes = [8, 32], strides = [1, 1]} : vector<8x128xf32> to vector<8x32xf32>
    %118 = arith.mulf %115, %84 : vector<8x32xf32>
    %119 = arith.mulf %114, %116 : vector<8x32xf32>
    %120 = arith.addf %118, %119 : vector<8x32xf32>
    %121 = math.tanh %120 : vector<8x32xf32>
    %122 = arith.mulf %117, %121 : vector<8x32xf32>
    %123 = vector.extract_strided_slice %5 {offsets = [24, 0], sizes = [8, 128], strides = [1, 1]} : vector<56x128xf32> to vector<8x128xf32>
    %cst_27 = arith.constant dense<0.000000e+00> : vector<8x128xf32>
    %124 = tpu.matmul %104, %6, %cst_27 {dimension_numbers = #tpu.dot_dimension_numbers<[1], [0], [0], [1], [0, 0, 1, 1], [], []>} : vector<8x32xf32>, vector<32x128xf32>, vector<8x128xf32> -> vector<8x128xf32>
    %125 = arith.addf %123, %124 : vector<8x128xf32>
    %126 = arith.negf %125 : vector<8x128xf32>
    %127 = math.exp %126 : vector<8x128xf32>
    %cst_28 = arith.constant 1.000000e+00 : f32
    %128 = vector.broadcast %cst_28 : f32 to vector<8x128xf32>
    %129 = arith.addf %128, %127 : vector<8x128xf32>
    %130 = arith.divf %128, %129 : vector<8x128xf32>
    %131 = math.tanh %125 : vector<8x128xf32>
    %132 = vector.extract_strided_slice %130 {offsets = [0, 0], sizes = [8, 32], strides = [1, 1]} : vector<8x128xf32> to vector<8x32xf32>
    %133 = vector.extract_strided_slice %130 {offsets = [0, 32], sizes = [8, 32], strides = [1, 1]} : vector<8x128xf32> to vector<8x32xf32>
    %134 = vector.extract_strided_slice %131 {offsets = [0, 64], sizes = [8, 32], strides = [1, 1]} : vector<8x128xf32> to vector<8x32xf32>
    %135 = vector.extract_strided_slice %130 {offsets = [0, 96], sizes = [8, 32], strides = [1, 1]} : vector<8x128xf32> to vector<8x32xf32>
    %136 = arith.mulf %133, %102 : vector<8x32xf32>
    %137 = arith.mulf %132, %134 : vector<8x32xf32>
    %138 = arith.addf %136, %137 : vector<8x32xf32>
    %139 = math.tanh %138 : vector<8x32xf32>
    %140 = arith.mulf %135, %139 : vector<8x32xf32>
    %141 = tpu.concatenate %140, %122 in 1 : vector<8x32xf32>, vector<8x32xf32> -> vector<8x64xf32>
    %cst_29 = arith.constant dense<0.000000e+00> : vector<8x128xf32>
    %142 = tpu.matmul %141, %7, %cst_29 {dimension_numbers = #tpu.dot_dimension_numbers<[1], [0], [0], [1], [0, 0, 1, 1], [], []>} : vector<8x64xf32>, vector<64x128xf32>, vector<8x128xf32> -> vector<8x128xf32>
    %143 = arith.addf %142, %10 : vector<8x128xf32>
    %144 = arith.negf %143 : vector<8x128xf32>
    %145 = math.exp %144 : vector<8x128xf32>
    %cst_30 = arith.constant 1.000000e+00 : f32
    %146 = vector.broadcast %cst_30 : f32 to vector<8x128xf32>
    %147 = arith.addf %146, %145 : vector<8x128xf32>
    %148 = arith.divf %146, %147 : vector<8x128xf32>
    %149 = math.tanh %143 : vector<8x128xf32>
    %150 = vector.extract_strided_slice %148 {offsets = [0, 0], sizes = [8, 32], strides = [1, 1]} : vector<8x128xf32> to vector<8x32xf32>
    %151 = vector.extract_strided_slice %148 {offsets = [0, 32], sizes = [8, 32], strides = [1, 1]} : vector<8x128xf32> to vector<8x32xf32>
    %152 = vector.extract_strided_slice %149 {offsets = [0, 64], sizes = [8, 32], strides = [1, 1]} : vector<8x128xf32> to vector<8x32xf32>
    %153 = vector.extract_strided_slice %148 {offsets = [0, 96], sizes = [8, 32], strides = [1, 1]} : vector<8x128xf32> to vector<8x32xf32>
    %154 = arith.mulf %151, %120 : vector<8x32xf32>
    %155 = arith.mulf %150, %152 : vector<8x32xf32>
    %156 = arith.addf %154, %155 : vector<8x32xf32>
    %157 = math.tanh %156 : vector<8x32xf32>
    %158 = arith.mulf %153, %157 : vector<8x32xf32>
    %159 = vector.extract_strided_slice %5 {offsets = [32, 0], sizes = [8, 128], strides = [1, 1]} : vector<56x128xf32> to vector<8x128xf32>
    %cst_31 = arith.constant dense<0.000000e+00> : vector<8x128xf32>
    %160 = tpu.matmul %140, %6, %cst_31 {dimension_numbers = #tpu.dot_dimension_numbers<[1], [0], [0], [1], [0, 0, 1, 1], [], []>} : vector<8x32xf32>, vector<32x128xf32>, vector<8x128xf32> -> vector<8x128xf32>
    %161 = arith.addf %159, %160 : vector<8x128xf32>
    %162 = arith.negf %161 : vector<8x128xf32>
    %163 = math.exp %162 : vector<8x128xf32>
    %cst_32 = arith.constant 1.000000e+00 : f32
    %164 = vector.broadcast %cst_32 : f32 to vector<8x128xf32>
    %165 = arith.addf %164, %163 : vector<8x128xf32>
    %166 = arith.divf %164, %165 : vector<8x128xf32>
    %167 = math.tanh %161 : vector<8x128xf32>
    %168 = vector.extract_strided_slice %166 {offsets = [0, 0], sizes = [8, 32], strides = [1, 1]} : vector<8x128xf32> to vector<8x32xf32>
    %169 = vector.extract_strided_slice %166 {offsets = [0, 32], sizes = [8, 32], strides = [1, 1]} : vector<8x128xf32> to vector<8x32xf32>
    %170 = vector.extract_strided_slice %167 {offsets = [0, 64], sizes = [8, 32], strides = [1, 1]} : vector<8x128xf32> to vector<8x32xf32>
    %171 = vector.extract_strided_slice %166 {offsets = [0, 96], sizes = [8, 32], strides = [1, 1]} : vector<8x128xf32> to vector<8x32xf32>
    %172 = arith.mulf %169, %138 : vector<8x32xf32>
    %173 = arith.mulf %168, %170 : vector<8x32xf32>
    %174 = arith.addf %172, %173 : vector<8x32xf32>
    %175 = math.tanh %174 : vector<8x32xf32>
    %176 = arith.mulf %171, %175 : vector<8x32xf32>
    %177 = tpu.concatenate %176, %158 in 1 : vector<8x32xf32>, vector<8x32xf32> -> vector<8x64xf32>
    %cst_33 = arith.constant dense<0.000000e+00> : vector<8x128xf32>
    %178 = tpu.matmul %177, %7, %cst_33 {dimension_numbers = #tpu.dot_dimension_numbers<[1], [0], [0], [1], [0, 0, 1, 1], [], []>} : vector<8x64xf32>, vector<64x128xf32>, vector<8x128xf32> -> vector<8x128xf32>
    %179 = arith.addf %178, %10 : vector<8x128xf32>
    %180 = arith.negf %179 : vector<8x128xf32>
    %181 = math.exp %180 : vector<8x128xf32>
    %cst_34 = arith.constant 1.000000e+00 : f32
    %182 = vector.broadcast %cst_34 : f32 to vector<8x128xf32>
    %183 = arith.addf %182, %181 : vector<8x128xf32>
    %184 = arith.divf %182, %183 : vector<8x128xf32>
    %185 = math.tanh %179 : vector<8x128xf32>
    %186 = vector.extract_strided_slice %184 {offsets = [0, 0], sizes = [8, 32], strides = [1, 1]} : vector<8x128xf32> to vector<8x32xf32>
    %187 = vector.extract_strided_slice %184 {offsets = [0, 32], sizes = [8, 32], strides = [1, 1]} : vector<8x128xf32> to vector<8x32xf32>
    %188 = vector.extract_strided_slice %185 {offsets = [0, 64], sizes = [8, 32], strides = [1, 1]} : vector<8x128xf32> to vector<8x32xf32>
    %189 = vector.extract_strided_slice %184 {offsets = [0, 96], sizes = [8, 32], strides = [1, 1]} : vector<8x128xf32> to vector<8x32xf32>
    %190 = arith.mulf %187, %156 : vector<8x32xf32>
    %191 = arith.mulf %186, %188 : vector<8x32xf32>
    %192 = arith.addf %190, %191 : vector<8x32xf32>
    %193 = math.tanh %192 : vector<8x32xf32>
    %194 = arith.mulf %189, %193 : vector<8x32xf32>
    %195 = vector.extract_strided_slice %5 {offsets = [40, 0], sizes = [8, 128], strides = [1, 1]} : vector<56x128xf32> to vector<8x128xf32>
    %cst_35 = arith.constant dense<0.000000e+00> : vector<8x128xf32>
    %196 = tpu.matmul %176, %6, %cst_35 {dimension_numbers = #tpu.dot_dimension_numbers<[1], [0], [0], [1], [0, 0, 1, 1], [], []>} : vector<8x32xf32>, vector<32x128xf32>, vector<8x128xf32> -> vector<8x128xf32>
    %197 = arith.addf %195, %196 : vector<8x128xf32>
    %198 = arith.negf %197 : vector<8x128xf32>
    %199 = math.exp %198 : vector<8x128xf32>
    %cst_36 = arith.constant 1.000000e+00 : f32
    %200 = vector.broadcast %cst_36 : f32 to vector<8x128xf32>
    %201 = arith.addf %200, %199 : vector<8x128xf32>
    %202 = arith.divf %200, %201 : vector<8x128xf32>
    %203 = math.tanh %197 : vector<8x128xf32>
    %204 = vector.extract_strided_slice %202 {offsets = [0, 0], sizes = [8, 32], strides = [1, 1]} : vector<8x128xf32> to vector<8x32xf32>
    %205 = vector.extract_strided_slice %202 {offsets = [0, 32], sizes = [8, 32], strides = [1, 1]} : vector<8x128xf32> to vector<8x32xf32>
    %206 = vector.extract_strided_slice %203 {offsets = [0, 64], sizes = [8, 32], strides = [1, 1]} : vector<8x128xf32> to vector<8x32xf32>
    %207 = vector.extract_strided_slice %202 {offsets = [0, 96], sizes = [8, 32], strides = [1, 1]} : vector<8x128xf32> to vector<8x32xf32>
    %208 = arith.mulf %205, %174 : vector<8x32xf32>
    %209 = arith.mulf %204, %206 : vector<8x32xf32>
    %210 = arith.addf %208, %209 : vector<8x32xf32>
    %211 = math.tanh %210 : vector<8x32xf32>
    %212 = arith.mulf %207, %211 : vector<8x32xf32>
    %213 = tpu.concatenate %212, %194 in 1 : vector<8x32xf32>, vector<8x32xf32> -> vector<8x64xf32>
    %cst_37 = arith.constant dense<0.000000e+00> : vector<8x128xf32>
    %214 = tpu.matmul %213, %7, %cst_37 {dimension_numbers = #tpu.dot_dimension_numbers<[1], [0], [0], [1], [0, 0, 1, 1], [], []>} : vector<8x64xf32>, vector<64x128xf32>, vector<8x128xf32> -> vector<8x128xf32>
    %215 = arith.addf %214, %10 : vector<8x128xf32>
    %216 = arith.negf %215 : vector<8x128xf32>
    %217 = math.exp %216 : vector<8x128xf32>
    %cst_38 = arith.constant 1.000000e+00 : f32
    %218 = vector.broadcast %cst_38 : f32 to vector<8x128xf32>
    %219 = arith.addf %218, %217 : vector<8x128xf32>
    %220 = arith.divf %218, %219 : vector<8x128xf32>
    %221 = math.tanh %215 : vector<8x128xf32>
    %222 = vector.extract_strided_slice %220 {offsets = [0, 0], sizes = [8, 32], strides = [1, 1]} : vector<8x128xf32> to vector<8x32xf32>
    %223 = vector.extract_strided_slice %220 {offsets = [0, 32], sizes = [8, 32], strides = [1, 1]} : vector<8x128xf32> to vector<8x32xf32>
    %224 = vector.extract_strided_slice %221 {offsets = [0, 64], sizes = [8, 32], strides = [1, 1]} : vector<8x128xf32> to vector<8x32xf32>
    %225 = vector.extract_strided_slice %220 {offsets = [0, 96], sizes = [8, 32], strides = [1, 1]} : vector<8x128xf32> to vector<8x32xf32>
    %226 = arith.mulf %223, %192 : vector<8x32xf32>
    %227 = arith.mulf %222, %224 : vector<8x32xf32>
    %228 = arith.addf %226, %227 : vector<8x32xf32>
    %229 = math.tanh %228 : vector<8x32xf32>
    %230 = arith.mulf %225, %229 : vector<8x32xf32>
    %231 = vector.extract_strided_slice %5 {offsets = [48, 0], sizes = [8, 128], strides = [1, 1]} : vector<56x128xf32> to vector<8x128xf32>
    %cst_39 = arith.constant dense<0.000000e+00> : vector<8x128xf32>
    %232 = tpu.matmul %212, %6, %cst_39 {dimension_numbers = #tpu.dot_dimension_numbers<[1], [0], [0], [1], [0, 0, 1, 1], [], []>} : vector<8x32xf32>, vector<32x128xf32>, vector<8x128xf32> -> vector<8x128xf32>
    %233 = arith.addf %231, %232 : vector<8x128xf32>
    %234 = arith.negf %233 : vector<8x128xf32>
    %235 = math.exp %234 : vector<8x128xf32>
    %cst_40 = arith.constant 1.000000e+00 : f32
    %236 = vector.broadcast %cst_40 : f32 to vector<8x128xf32>
    %237 = arith.addf %236, %235 : vector<8x128xf32>
    %238 = arith.divf %236, %237 : vector<8x128xf32>
    %239 = math.tanh %233 : vector<8x128xf32>
    %240 = vector.extract_strided_slice %238 {offsets = [0, 0], sizes = [8, 32], strides = [1, 1]} : vector<8x128xf32> to vector<8x32xf32>
    %241 = vector.extract_strided_slice %238 {offsets = [0, 32], sizes = [8, 32], strides = [1, 1]} : vector<8x128xf32> to vector<8x32xf32>
    %242 = vector.extract_strided_slice %239 {offsets = [0, 64], sizes = [8, 32], strides = [1, 1]} : vector<8x128xf32> to vector<8x32xf32>
    %243 = vector.extract_strided_slice %238 {offsets = [0, 96], sizes = [8, 32], strides = [1, 1]} : vector<8x128xf32> to vector<8x32xf32>
    %244 = arith.mulf %241, %210 : vector<8x32xf32>
    %245 = arith.mulf %240, %242 : vector<8x32xf32>
    %246 = arith.addf %244, %245 : vector<8x32xf32>
    %247 = math.tanh %246 : vector<8x32xf32>
    %248 = arith.mulf %243, %247 : vector<8x32xf32>
    %249 = tpu.concatenate %248, %230 in 1 : vector<8x32xf32>, vector<8x32xf32> -> vector<8x64xf32>
    %cst_41 = arith.constant dense<0.000000e+00> : vector<8x128xf32>
    %250 = tpu.matmul %249, %7, %cst_41 {dimension_numbers = #tpu.dot_dimension_numbers<[1], [0], [0], [1], [0, 0, 1, 1], [], []>} : vector<8x64xf32>, vector<64x128xf32>, vector<8x128xf32> -> vector<8x128xf32>
    %251 = arith.addf %250, %10 : vector<8x128xf32>
    %252 = arith.negf %251 : vector<8x128xf32>
    %253 = math.exp %252 : vector<8x128xf32>
    %cst_42 = arith.constant 1.000000e+00 : f32
    %254 = vector.broadcast %cst_42 : f32 to vector<8x128xf32>
    %255 = arith.addf %254, %253 : vector<8x128xf32>
    %256 = arith.divf %254, %255 : vector<8x128xf32>
    %257 = math.tanh %251 : vector<8x128xf32>
    %258 = vector.extract_strided_slice %256 {offsets = [0, 0], sizes = [8, 32], strides = [1, 1]} : vector<8x128xf32> to vector<8x32xf32>
    %259 = vector.extract_strided_slice %256 {offsets = [0, 32], sizes = [8, 32], strides = [1, 1]} : vector<8x128xf32> to vector<8x32xf32>
    %260 = vector.extract_strided_slice %257 {offsets = [0, 64], sizes = [8, 32], strides = [1, 1]} : vector<8x128xf32> to vector<8x32xf32>
    %261 = vector.extract_strided_slice %256 {offsets = [0, 96], sizes = [8, 32], strides = [1, 1]} : vector<8x128xf32> to vector<8x32xf32>
    %262 = arith.mulf %259, %228 : vector<8x32xf32>
    %263 = arith.mulf %258, %260 : vector<8x32xf32>
    %264 = arith.addf %262, %263 : vector<8x32xf32>
    %265 = math.tanh %264 : vector<8x32xf32>
    %266 = arith.mulf %261, %265 : vector<8x32xf32>
    %267 = tpu.concatenate %50, %86, %122, %158, %194, %230, %266 in 0 : vector<8x32xf32>, vector<8x32xf32>, vector<8x32xf32>, vector<8x32xf32>, vector<8x32xf32>, vector<8x32xf32>, vector<8x32xf32> -> vector<56x32xf32>
    %c0_43 = arith.constant 0 : index
    %c0_44 = arith.constant 0 : index
    %268 = vector.load %arg7[%c0_43, %c0_44] : memref<32x128xf32, #tpu.memory_space<vmem>>, vector<32x128xf32>
    %cst_45 = arith.constant dense<0.000000e+00> : vector<56x128xf32>
    %269 = tpu.matmul %267, %268, %cst_45 {dimension_numbers = #tpu.dot_dimension_numbers<[1], [0], [0], [1], [0, 0, 1, 1], [], []>} : vector<56x32xf32>, vector<32x128xf32>, vector<56x128xf32> -> vector<56x128xf32>
    %c0_46 = arith.constant 0 : index
    %c0_47 = arith.constant 0 : index
    %270 = vector.load %arg8[%c0_46, %c0_47] : memref<1x128xf32, #tpu.memory_space<vmem>>, vector<1x128xf32>
    %271 = vector.broadcast %270 : vector<1x128xf32> to vector<56x128xf32>
    %272 = arith.addf %269, %271 : vector<56x128xf32>
    %c0_48 = arith.constant 0 : index
    %c0_49 = arith.constant 0 : index
    %273 = vector.load %arg9[%c0_48, %c0_49] : memref<56x128xf32, #tpu.memory_space<vmem>>, vector<56x128xf32>
    tpu.vector_store %arg9[%c0_48, %c0_49], %272 {strides = array<i32>} : memref<56x128xf32, #tpu.memory_space<vmem>>, vector<56x128xf32>,
    return
  }
  func.func @transform_0(%arg0: i32) -> (i32, i32) {
    %c0_i32 = arith.constant 0 : i32
    %c0_i32_0 = arith.constant 0 : i32
    %c0_i32_1 = arith.constant 0 : i32
    return %c0_i32, %c0_i32_0 : i32, i32
  }
  func.func @transform_1(%arg0: i32) -> (i32, i32) {
    %c0_i32 = arith.constant 0 : i32
    %c0_i32_0 = arith.constant 0 : i32
    %c0_i32_1 = arith.constant 0 : i32
    return %c0_i32, %c0_i32_0 : i32, i32
  }
  func.func @transform_2(%arg0: i32) -> (i32, i32) {
    %c0_i32 = arith.constant 0 : i32
    %c0_i32_0 = arith.constant 0 : i32
    %c0_i32_1 = arith.constant 0 : i32
    return %c0_i32, %c0_i32_0 : i32, i32
  }
  func.func @transform_3(%arg0: i32) -> (i32, i32) {
    %c0_i32 = arith.constant 0 : i32
    %c0_i32_0 = arith.constant 0 : i32
    %c0_i32_1 = arith.constant 0 : i32
    return %c0_i32, %c0_i32_0 : i32, i32
  }
  func.func @transform_4(%arg0: i32) -> (i32, i32) {
    %c0_i32 = arith.constant 0 : i32
    %c0_i32_0 = arith.constant 0 : i32
    %c0_i32_1 = arith.constant 0 : i32
    return %c0_i32, %c0_i32_0 : i32, i32
  }
  func.func @transform_5(%arg0: i32) -> (i32, i32) {
    %c0_i32 = arith.constant 0 : i32
    %c0_i32_0 = arith.constant 0 : i32
    %c0_i32_1 = arith.constant 0 : i32
    return %c0_i32, %c0_i32_0 : i32, i32
  }
  func.func @transform_6(%arg0: i32) -> (i32, i32) {
    %c0_i32 = arith.constant 0 : i32
    %c0_i32_0 = arith.constant 0 : i32
    %c0_i32_1 = arith.constant 0 : i32
    return %c0_i32, %c0_i32_0 : i32, i32
  }
  func.func @transform_7(%arg0: i32) -> (i32, i32) {
    %c0_i32 = arith.constant 0 : i32
    %c0_i32_0 = arith.constant 0 : i32
    %c0_i32_1 = arith.constant 0 : i32
    return %c0_i32, %c0_i32_0 : i32, i32
  }
  func.func @transform_8(%arg0: i32) -> (i32, i32) {
    %c0_i32 = arith.constant 0 : i32
    %c0_i32_0 = arith.constant 0 : i32
    %c0_i32_1 = arith.constant 0 : i32
    return %c0_i32, %c0_i32_0 : i32, i32
  }
}

</mosaic_0001>

<bundles_post_ra>
// kernel: tpu_custom_call.1
= control target key start
LH: loop header
LB: loop body
LE: loop exit
PB: predicated region body
PF: predicated region fallthrough
CT: control target
= control target key end

     0   :  { %13 = vsyncpa [#allocation3], 0  ;;  %s3041_s0 = inlined_call_operand.vmem [shape: f32[56,32], index: 0, kind: input, shape index: {}]   ;;  %s3042_s1 = inlined_call_operand.hbm [shape: f32[32,128], index: 1, kind: input, shape index: {}]   ;;  %s3043_s2 = inlined_call_operand.vmem [shape: f32[1,128], index: 2, kind: input, shape index: {}]   ;;  %s3044_s3 = inlined_call_operand.hbm [shape: f32[32,128], index: 3, kind: input, shape index: {}]   ;;  %s3045_s4 = inlined_call_operand.vmem [shape: f32[64,128], index: 4, kind: input, shape index: {}]   ;;  %s3046_s5 = inlined_call_operand.hbm [shape: f32[1,128], index: 5, kind: input, shape index: {}]   ;;  %s3047_s6 = inlined_call_operand.vmem [shape: f32[32,128], index: 6, kind: input, shape index: {}]   ;;  %s3048_s7 = inlined_call_operand.vmem [shape: f32[1,128], index: 7, kind: input, shape index: {}]   ;;  %s3049_s8 = inlined_call_operand.hbm [shape: f32[56,128], index: 8, kind: output, shape index: {}]  }
   0x1   :  { %14 = vsyncpa [#allocation6], 0 }
   0x2   :  { %15 = vsyncpa [#allocation4], 0  ;;  %s2453_s27 = smov [#allocation5]   ;;  %s2454_s29 = smov [#allocation2]  }
   0x3   :  { %s37_s28 = sshll.u32 %s2453_s27, 4  ;;  %s23_s30 = sshll.u32 %s2454_s29, 4  ;;  %s38_s28 = int_to_ptr.vmem [resolvable:$true] %s37_s28  ;;  %s24_s30 = int_to_ptr.vmem [resolvable:$true] %s23_s30 }
   0x4   :  { %s2375_s9 = scalar_lea.vmem %s38_s28, 512  ;;  %p2380_p1 = scmp.lt.s32.totalorder %s38_s28, %s38_s28 }
   0x5   :  { %p2376_p0 = scmp.ne.s32.totalorder %s38_s28, %s2375_s9  ;;  %p2381_p2 = scmp.lt.s32.totalorder %s2375_s9, %s2375_s9 }
   0x7   :  { %p2382_p3 = por %p2381_p2, %p2380_p1 }
   0x9   :  { %p2383_p4 = pnand %p2382_p3, %p2376_p0 }
   0xb   :  { %2386 = shalt.err (!%p2383_p4)
}
   0xc   :  { %s2455_s10 = smov 128   ;;  %s2456_s11 = smov 8  }
   0xd   :  { %43 = dma.hbm_to_vmem [thread:$0]  %s3044_s3, 512, %s38_s28, [#allocation6], %s2455_s10, %s2455_s10, %s2456_s11  }
   0xe   :  { %s2395_s14 = scalar_lea.vmem %s24_s30, 512  ;;  %p2400_p6 = scmp.lt.s32.totalorder %s24_s30, %s24_s30 }
   0xf   :  { %p2396_p5 = scmp.ne.s32.totalorder %s24_s30, %s2395_s14  ;;  %p2401_p7 = scmp.lt.s32.totalorder %s2395_s14, %s2395_s14 }
  0x11   :  { %p2402_p8 = por %p2401_p7, %p2400_p6 }
  0x13   :  { %p2403_p9 = pnand %p2402_p8, %p2396_p5 }
  0x15   :  { %2406 = shalt.err (!%p2403_p9)
}
  0x16   :  { %29 = dma.hbm_to_vmem [thread:$0]  %s3042_s1, 512, %s24_s30, [#allocation3], %s2455_s10, %s2455_s10, %s2456_s11  }
  0x17   :  { %s2457_s17 = smov [#allocation7]  }
  0x18   :  { %s52_s18 = sshll.u32 %s2457_s17, 4  ;;  %s53_s18 = int_to_ptr.vmem [resolvable:$true] %s52_s18 }
  0x19   :  { %s2415_s19 = scalar_lea.vmem %s53_s18, 16  ;;  %s2419_s3 = scalar_lea.vmem %s53_s18, 32 }
  0x1a   :  { %p2416_p10 = scmp.ne.s32.totalorder %s53_s18, %s2415_s19  ;;  %p2420_p11 = scmp.lt.s32.totalorder %s53_s18, %s53_s18 }
  0x1b   :  { %p2421_p12 = scmp.lt.s32.totalorder %s2419_s3, %s2415_s19 }
  0x1d   :  { %p2422_p13 = por %p2421_p12, %p2420_p11 }
  0x1f   :  { %p2423_p0 = pnand %p2422_p13, %p2416_p10 }
  0x21   :  { %2426 = shalt.err (!%p2423_p0)
}
  0x22   :  { %55 = dma.hbm_to_vmem [thread:$0]  %s3046_s5, 16, %s53_s18, [#allocation6]  }
  0x23   :  { %2447 = dma.done.wait [#allocation3], 512  }
  0x24   :  { %2448 = vsyncadd [#allocation3], 4294966784 }
  0x25   :  { %2449 = dma.done.wait [#allocation6], 528  }
  0x26   :  { %2450 = vsyncadd [#allocation6], 4294966768  ;;  %v2458_v0 = vmov 0.0   ;;  %vm2459_vm0 = vmmov 0   ;;  %v79_v1 = vld [vmem:[#allocation2 + $0x18] sm:$0xff]  ;;  %v78_v3 = vld [vmem:[#allocation2 + $0x10] sm:$0xff] }
  0x27   :  { %1976 = vmatprep.subr.mxu0 %v2458_v0  ;;  %2005 = vmatprep.subr.mxu1 %v2458_v0  ;;  %v2529_v2 = vld [vmem:[#allocation5 + $0x18] sm:$0xff]  ;;  %v2532_v4 = vld [vmem:[#allocation5 + $0x10] sm:$0xff]  ;;  %v77_v5 = vld [vmem:[#allocation2 + $0x8] sm:$0xff]  ;;  %vm87_vm1 = vcmask 261120   ;;  %s2460_s24 = smov 64   ;;  %s2461_s25 = smov 32  }
  0x28   :  { %1984 = vmatprep.mubr.msk.f32.mxu0 %vm2459_vm0, %v2458_v0  ;;  %2013 = vmatprep.mubr.msk.f32.mxu1 %vm2459_vm0, %v2458_v0  ;;  %v2536_v6 = vld [vmem:[#allocation5 + $0x8] sm:$0xff]  ;;  %v76_v7 = vld [vmem:[#allocation2] sm:$0xff]  ;;  %v2572_v27 = vld [vmem:[%s3045_s4 + $0x38] sm:$0xff]  ;;  %vm331_vm2 = vcmask 523264  }
  0x29   :  { %1977 = vmatpush3.msra.mxu0 %v79_v1  ;;  %2006 = vmatpush3.msra.mxu1 %v2529_v2  ;;  %v2541_v8 = vld [vmem:[#allocation5] sm:$0xff]  ;;  %v2577_v28 = vld [vmem:[%s3045_s4 + $0x30] sm:$0xff]  ;;  %v2585_v29 = vld [vmem:[%s3045_s4 + $0x28] sm:$0xff] }
  0x2a   :  { %1978 = vmatprep.subr.mxu0 %v2458_v0  ;;  %2007 = vmatprep.subr.mxu1 %v2458_v0  ;;  %v69_v9 = vld [vmem:[%s3041_s0] sm:$0xff]  ;;  %v2603_v31 = vld [vmem:[%s3045_s4 + $0x18] sm:$0xff]  ;;  %v2612_v32 = vld [vmem:[%s3045_s4 + $0x10] sm:$0xff] }
  0x2b   :  { %1979 = vmatpush3.msra.mxu0 %v78_v3  ;;  %2008 = vmatpush3.msra.mxu1 %v2532_v4  ;;  %v2561_v10 = vld [vmem:[%s3043_s2] ss:$0 sm:$0xff]  ;;  %v2621_v34 = vld [vmem:[%s3045_s4 + $0x8] sm:$0xff] }
  0x2c   :  { %1980 = vmatprep.subr.mxu0 %v2458_v0  ;;  %2009 = vmatprep.subr.mxu1 %v2458_v0  ;;  %v2594_v30 = vld [vmem:[%s3045_s4 + $0x20] sm:$0xff]  ;;  %v70_v36 = vld [vmem:[%s3041_s0 + $0x8] sm:$0xff] }
  0x2d   :  { %1981 = vmatpush3.msra.mxu0 %v77_v5  ;;  %2010 = vmatpush3.msra.mxu1 %v2536_v6  ;;  %v2630_v35 = vld [vmem:[%s3045_s4] sm:$0xff] }
  0x2e   :  { %1982 = vmatprep.subr.mxu0 %v2458_v0  ;;  %2011 = vmatprep.subr.mxu1 %v2458_v0  ;;  %v2672_v43 = vld [vmem:[#allocation7] ss:$0 sm:$0xff] }
  0x2f   :  { %1983 = vmatpush3.msra.mxu0 %v76_v7  ;;  %2012 = vmatpush3.msra.mxu1 %v2541_v8 }
  0x30   :  { %1985 = vmatmul.mubr.msk.f32.vlgmr.msra.gmra.mxu0 %vm87_vm1, %v69_v9  ;;  %2014 = vmatmul.mubr.f32.vlgmr.msra.gmra.mxu1 %v2458_v0 }
  0x31   :  { %2016 = vmatprep.subr.mxu1 %v2458_v0  ;;  %2032 = vmatprep.mubr.msk.f32.mxu1 %vm2459_vm0, %v2458_v0 }
  0x32   :  { %1987 = vmatprep.mubr.msk.f32.mxu0 %vm2459_vm0, %v2458_v0  ;;  %2046 = vmatprep.subr.mxu0 %v2458_v0 }
  0x33   :  { %2017 = vmatpush3.msra.mxu1 %v2572_v27  ;;  %2047 = vmatpush3.msra.mxu0 %v2572_v27 }
  0x34   :  { %2018 = vmatprep.subr.mxu1 %v2458_v0  ;;  %2048 = vmatprep.subr.mxu0 %v2458_v0 }
  0x35   :  { %2019 = vmatpush3.msra.mxu1 %v2577_v28  ;;  %2049 = vmatpush3.msra.mxu0 %v2577_v28 }
  0x36   :  { %2020 = vmatprep.subr.mxu1 %v2458_v0  ;;  %2050 = vmatprep.subr.mxu0 %v2458_v0 }
  0x37   :  { %2021 = vmatpush3.msra.mxu1 %v2585_v29  ;;  %2051 = vmatpush3.msra.mxu0 %v2585_v29 }
  0x38   :  { %2022 = vmatprep.subr.mxu1 %v2458_v0  ;;  %2052 = vmatprep.subr.mxu0 %v2458_v0 }
  0x39   :  { %2023 = vmatpush3.msra.mxu1 %v2594_v30  ;;  %2053 = vmatpush3.msra.mxu0 %v2594_v30 }
  0x3a   :  { %2024 = vmatprep.subr.mxu1 %v2458_v0  ;;  %2054 = vmatprep.subr.mxu0 %v2458_v0 }
  0x3b   :  { %2025 = vmatpush3.msra.mxu1 %v2603_v31  ;;  %2055 = vmatpush3.msra.mxu0 %v2603_v31 }
  0x3c   :  { %2026 = vmatprep.subr.mxu1 %v2458_v0  ;;  %2056 = vmatprep.subr.mxu0 %v2458_v0 }
  0x3d   :  { %2027 = vmatpush3.msra.mxu1 %v2612_v32  ;;  %2057 = vmatpush3.msra.mxu0 %v2612_v32 }
  0x3e   :  { %2028 = vmatprep.subr.mxu1 %v2458_v0  ;;  %2058 = vmatprep.subr.mxu0 %v2458_v0 }
  0x3f   :  { %2029 = vmatpush3.msra.mxu1 %v2621_v34  ;;  %2059 = vmatpush3.msra.mxu0 %v2621_v34 }
  0x40   :  { %2030 = vmatprep.subr.mxu1 %v2458_v0  ;;  %2060 = vmatprep.subr.mxu0 %v2458_v0 }
  0x41   :  { %2031 = vmatpush3.msra.mxu1 %v2630_v35  ;;  %2061 = vmatpush3.msra.mxu0 %v2630_v35 }
  0x42   :  { %2035 = vmatprep.subr.mxu1 %v2458_v0  ;;  %2065 = vmatprep.subr.mxu0 %v2458_v0 }
  0x43   :  { %1988 = vmatmul.mubr.msk.f32.gmra.mxu0 %vm87_vm1, %v70_v36 }
  0x44   :  { %1990 = vmatprep.mubr.msk.f32.mxu0 %vm2459_vm0, %v2458_v0 }
  0xf0   :  { %v175_v11 = vpop.f32.mrf.mxu0  ;;  %v297_v12 = vpop.f32.mrf.mxu1 }
  0xf1   :  { %v176_v13 = vadd.f32 %v2561_v10, %v175_v11 }
  0xf2   :  { %v1986_v14 = vpop.f32.mrf.mxu0  ;;  %v2015_v15 = vpop.f32.mrf.mxu1 }
  0xf3   :  { %v301_v16 = vadd.f32 %v297_v12, %v176_v13  ;;  %v71_v13 = vld [vmem:[%s3041_s0 + $0x10] sm:$0xff]  ;;  %v72_v15 = vld [vmem:[%s3041_s0 + $0x18] sm:$0xff] }
  0xf4   :  { %1991 = vmatmul.mubr.msk.f32.gmra.mxu0 %vm87_vm1, %v71_v13 }
  0xf5   :  { %2254 = vtanh.f32 %v301_v16  ;;  %v1821_v18 = vmul.f32 -1.442695, %v301_v16  ;;  %1993 = vmatprep.mubr.msk.f32.mxu0 %vm2459_vm0, %v2458_v0  ;;  %v73_v16 = vld [vmem:[%s3041_s0 + $0x20] sm:$0xff] }
  0xf7   :  { %2256 = vpow2.f32 %v1821_v18  ;;  %v74_v18 = vld [vmem:[%s3041_s0 + $0x28] sm:$0xff] }
  0xf8   :  { %1994 = vmatmul.mubr.msk.f32.gmra.mxu0 %vm87_vm1, %v72_v15 }
  0xf9   :  { %1996 = vmatprep.mubr.msk.f32.mxu0 %vm2459_vm0, %v2458_v0 }
  0xfc   :  { %1997 = vmatmul.mubr.msk.f32.gmra.mxu0 %vm87_vm1, %v73_v16 }
  0xfd   :  { %1999 = vmatprep.mubr.msk.f32.mxu0 %vm2459_vm0, %v2458_v0 }
 0x100   :  { %2000 = vmatmul.mubr.msk.f32.gmra.mxu0 %vm87_vm1, %v74_v18 }
 0x101   :  { %2002 = vmatprep.mubr.msk.f32.mxu0 %vm2459_vm0, %v2458_v0 }
 0x102   :  { %v2255_v17 = vpop.eup %2254 }
 0x103   :  { %311 = vrot.lane.b32.xlu0 %v2255_v17, %s2460_s24  ;;  %v180_v41 = vpop.f32.mrf.mxu0 }
 0x104   :  { %v2257_v19 = vpop.eup %2256  ;;  %v181_v47 = vadd.f32 %v2561_v10, %v180_v41 }
 0x105   :  { %v305_v20 = vadd.f32 1.0, %v2257_v19  ;;  %v1989_v42 = vpop.f32.mrf.mxu0  ;;  %v75_v19 = vld [vmem:[%s3041_s0 + $0x30] sm:$0xff] }
 0x106   :  { %2003 = vmatmul.mubr.msk.f32.gmra.mxu0 %vm87_vm1, %v75_v19 }
 0x107   :  { %2258 = vrcp.f32 %v305_v20  ;;  %2062 = vmatprep.mubr.msk.f32.mxu0 %vm2459_vm0, %v2458_v0 }
 0x114   :  { %v2259_v21 = vpop.eup %2258 }
 0x115   :  { %v309_v24 = vmul.f32 0.0, %v2259_v21 }
 0x175   :  { %v312_v22 = vpop.permute.xlu0 %311 }
 0x176   :  { %v314_v23 = vmul.f32 %v2259_v21, %v312_v22 }
 0x178   :  { %316 = vrot.lane.b32.xlu0 %v314_v23, %s2461_s25 }
 0x1ea   :  { %v317_v25 = vpop.permute.xlu0 %316 }
 0x1eb   :  { %v2566_v26 = vadd.f32 %v317_v25, %v309_v24  ;;  %v185_v24 = vpop.f32.mrf.mxu0 }
 0x1ed   :  { %2260 = vtanh.f32 %v2566_v26  ;;  %v1992_v25 = vpop.f32.mrf.mxu0 }
 0x1fa   :  { %v2261_v33 = vpop.eup %2260 }
 0x1fb   :  { %322 = vrot.lane.b32.xlu1 %v2261_v33, %s2460_s24 }
 0x26d   :  { %v323_v37 = vpop.permute.xlu1 %322 }
 0x26e   :  { %v325_v38 = vmul.f32 %v2259_v21, %v323_v37 }
 0x270   :  { %327 = vrot.lane.b32.xlu1 %v325_v38, %s2461_s25 }
 0x2e2   :  { %v328_v39 = vpop.permute.xlu1 %327 }
 0x2e3   :  { %v330_v40 = vsel %vm87_vm1, %v328_v39, 0.0 }
 0x2e4   :  { %2033 = vmatmul.mubr.msk.f32.vlgmr.msra.gmra.mxu1 %vm331_vm2, %v330_v40 }
 0x2e5   :  { %2036 = vmatpush3.msra.mxu1 %v2529_v2  ;;  %2043 = vmatprep.mubr.msk.f32.mxu1 %vm2459_vm0, %v2458_v0 }
 0x2e6   :  { %2037 = vmatprep.subr.mxu1 %v2458_v0 }
 0x2e7   :  { %2038 = vmatpush3.msra.mxu1 %v2532_v4 }
 0x2e8   :  { %2039 = vmatprep.subr.mxu1 %v2458_v0 }
 0x2e9   :  { %2040 = vmatpush3.msra.mxu1 %v2536_v6 }
 0x2ea   :  { %2041 = vmatprep.subr.mxu1 %v2458_v0 }
 0x2eb   :  { %2042 = vmatpush3.msra.mxu1 %v2541_v8 }
 0x2ec   :  { %2044 = vmatmul.mubr.msk.f32.vlgmr.msra.gmra.mxu1 %vm87_vm1, %v328_v39  ;;  %2095 = vmatprep.subr.mxu1 %v2458_v0 }
 0x2ed   :  { %2096 = vmatpush3.msra.mxu1 %v2529_v2  ;;  %2103 = vmatprep.mubr.msk.f32.mxu1 %vm2459_vm0, %v2458_v0 }
 0x2ee   :  { %2097 = vmatprep.subr.mxu1 %v2458_v0 }
 0x2ef   :  { %2098 = vmatpush3.msra.mxu1 %v2532_v4 }
 0x2f0   :  { %2099 = vmatprep.subr.mxu1 %v2458_v0 }
 0x2f1   :  { %2100 = vmatpush3.msra.mxu1 %v2536_v6 }
 0x2f2   :  { %2101 = vmatprep.subr.mxu1 %v2458_v0 }
 0x2f3   :  { %2102 = vmatpush3.msra.mxu1 %v2541_v8 }
 0x2f4   :  { %2106 = vmatprep.subr.mxu1 %v2458_v0 }
 0x3a4   :  { %v401_v44 = vpop.f32.mrf.mxu1 }
 0x3a5   :  { %v402_v45 = vadd.f32 %v2672_v43, %v401_v44 }
 0x3a6   :  { %v2034_v46 = vpop.f32.mrf.mxu1 }
 0x3a7   :  { %2262 = vtanh.f32 %v402_v45  ;;  %v1823_v53 = vmul.f32 -1.442695, %v402_v45 }
 0x3ac   :  { %v497_v48 = vpop.f32.mrf.mxu1 }
 0x3ad   :  { %v501_v49 = vadd.f32 %v497_v48, %v181_v47 }
 0x3ae   :  { %v2045_v50 = vpop.f32.mrf.mxu1 }
 0x3af   :  { %2264 = vtanh.f32 %v501_v49  ;;  %v1825_v54 = vmul.f32 -1.442695, %v501_v49  ;;  %v186_v49 = vadd.f32 %v2561_v10, %v185_v24 }
 0x3b0   :  { %2266 = vpow2.f32 %v1823_v53 }
 0x3b1   :  { %2268 = vpow2.f32 %v1825_v54 }
 0x3b4   :  { %v2263_v51 = vpop.eup %2262 }
 0x3b5   :  { %414 = vrot.lane.b32.xlu0 %v2263_v51, %s2460_s24 }
 0x3bc   :  { %v2265_v52 = vpop.eup %2264 }
 0x3bd   :  { %511 = vrot.lane.b32.xlu1 %v2265_v52, %s2460_s24  ;;  %v2267_v55 = vpop.eup %2266 }
 0x3be   :  { %v408_v56 = vadd.f32 1.0, %v2267_v55  ;;  %v2269_v57 = vpop.eup %2268 }
 0x3bf   :  { %v505_v58 = vadd.f32 1.0, %v2269_v57 }
 0x3c0   :  { %2270 = vrcp.f32 %v408_v56 }
 0x3c1   :  { %2272 = vrcp.f32 %v505_v58 }
 0x3cd   :  { %v2271_v59 = vpop.eup %2270 }
 0x3ce   :  { %v2273_v62 = vpop.eup %2272  ;;  %v412_v3 = vmul.f32 0.0, %v2271_v59 }
 0x3cf   :  { %v509_v9 = vmul.f32 %v2273_v62, %v2566_v26  ;;  %v2724_v26 = vpop.f32.mrf.mxu0 }
 0x3d0   :  { %v191_v25 = vadd.f32 %v2561_v10, %v2724_v26 }
 0x3d1   :  { %v1995_v33 = vpop.f32.mrf.mxu0 }
 0x3d3   :  { %v2726_v36 = vpop.f32.mrf.mxu0 }
 0x3d5   :  { %v1998_v37 = vpop.f32.mrf.mxu0 }
 0x3d7   :  { %v2728_v38 = vpop.f32.mrf.mxu0 }
 0x3d9   :  { %v2001_v39 = vpop.f32.mrf.mxu0 }
 0x3db   :  { %v2761_v44 = vpop.f32.mrf.mxu0 }
 0x3dd   :  { %v2004_v45 = vpop.f32.mrf.mxu0 }
 0x427   :  { %v415_v60 = vpop.permute.xlu0 %414 }
 0x428   :  { %v417_v61 = vmul.f32 %v2271_v59, %v415_v60 }
 0x42a   :  { %419 = vrot.lane.b32.xlu0 %v417_v61, %s2461_s25 }
 0x42f   :  { %v512_v63 = vpop.permute.xlu1 %511 }
 0x430   :  { %v514_v1 = vmul.f32 %v2273_v62, %v512_v63 }
 0x432   :  { %516 = vrot.lane.b32.xlu1 %v514_v1, %s2461_s25 }
 0x49c   :  { %v420_v5 = vpop.permute.xlu0 %419 }
 0x49d   :  { %v2680_v7 = vadd.f32 %v420_v5, %v412_v3 }
 0x49f   :  { %2274 = vtanh.f32 %v2680_v7 }
 0x4a4   :  { %v517_v11 = vpop.permute.xlu1 %516 }
 0x4a5   :  { %v2684_v12 = vadd.f32 %v517_v11, %v509_v9 }
 0x4a7   :  { %2276 = vtanh.f32 %v2684_v12 }
 0x4ac   :  { %v2275_v14 = vpop.eup %2274 }
 0x4ad   :  { %425 = vrot.lane.b32.xlu0 %v2275_v14, %s2460_s24 }
 0x4b4   :  { %v2277_v17 = vpop.eup %2276 }
 0x4b5   :  { %522 = vrot.lane.b32.xlu1 %v2277_v17, %s2460_s24 }
 0x51f   :  { %v426_v20 = vpop.permute.xlu0 %425 }
 0x520   :  { %v2719_v21 = vmul.f32 %v2271_v59, %v426_v20 }
 0x522   :  { %531 = vrot.lane.b32.xlu1 %v2719_v21, %s2460_s24 }
 0x527   :  { %v523_v22 = vpop.permute.xlu1 %522 }
 0x528   :  { %v525_v23 = vmul.f32 %v2273_v62, %v523_v22 }
 0x52a   :  { %527 = vrot.lane.b32.xlu0 %v525_v23, %s2461_s25 }
 0x594   :  { %v532_v40 = vpop.permute.xlu1 %531 }
 0x59c   :  { %v528_v41 = vpop.permute.xlu0 %527 }
 0x59d   :  { %v534_v42 = vsel %vm87_vm1, %v528_v41, %v532_v40 }
 0x59e   :  { %2063 = vmatmul.mubr.msk.f32.vlgmr.msra.gmra.mxu0 %vm331_vm2, %v534_v42 }
 0x59f   :  { %2066 = vmatpush3.msra.mxu0 %v2529_v2  ;;  %2073 = vmatprep.mubr.msk.f32.mxu0 %vm2459_vm0, %v2458_v0 }
 0x5a0   :  { %2067 = vmatprep.subr.mxu0 %v2458_v0 }
 0x5a1   :  { %2068 = vmatpush3.msra.mxu0 %v2532_v4 }
 0x5a2   :  { %2069 = vmatprep.subr.mxu0 %v2458_v0 }
 0x5a3   :  { %2070 = vmatpush3.msra.mxu0 %v2536_v6 }
 0x5a4   :  { %2071 = vmatprep.subr.mxu0 %v2458_v0 }
 0x5a5   :  { %2072 = vmatpush3.msra.mxu0 %v2541_v8 }
 0x5a6   :  { %2074 = vmatmul.mubr.msk.f32.vlgmr.msra.gmra.mxu0 %vm87_vm1, %v528_v41  ;;  %2076 = vmatprep.subr.mxu0 %v2458_v0 }
 0x5a7   :  { %2077 = vmatpush3.msra.mxu0 %v2572_v27  ;;  %2092 = vmatprep.mubr.msk.f32.mxu0 %vm2459_vm0, %v2458_v0 }
 0x5a8   :  { %2078 = vmatprep.subr.mxu0 %v2458_v0 }
 0x5a9   :  { %2079 = vmatpush3.msra.mxu0 %v2577_v28 }
 0x5aa   :  { %2080 = vmatprep.subr.mxu0 %v2458_v0 }
 0x5ab   :  { %2081 = vmatpush3.msra.mxu0 %v2585_v29 }
 0x5ac   :  { %2082 = vmatprep.subr.mxu0 %v2458_v0 }
 0x5ad   :  { %2083 = vmatpush3.msra.mxu0 %v2594_v30 }
 0x5ae   :  { %2084 = vmatprep.subr.mxu0 %v2458_v0 }
 0x5af   :  { %2085 = vmatpush3.msra.mxu0 %v2603_v31 }
 0x5b0   :  { %2086 = vmatprep.subr.mxu0 %v2458_v0 }
 0x5b1   :  { %2087 = vmatpush3.msra.mxu0 %v2612_v32 }
 0x5b2   :  { %2088 = vmatprep.subr.mxu0 %v2458_v0 }
 0x5b3   :  { %2089 = vmatpush3.msra.mxu0 %v2621_v34 }
 0x5b4   :  { %2090 = vmatprep.subr.mxu0 %v2458_v0 }
 0x5b5   :  { %2091 = vmatpush3.msra.mxu0 %v2630_v35 }
 0x5b6   :  { %2125 = vmatprep.subr.mxu0 %v2458_v0 }
 0x65e   :  { %v604_v46 = vpop.f32.mrf.mxu0 }
 0x65f   :  { %v605_v47 = vadd.f32 %v2672_v43, %v604_v46 }
 0x660   :  { %v2064_v48 = vpop.f32.mrf.mxu0 }
 0x661   :  { %2278 = vtanh.f32 %v605_v47  ;;  %v1827_v55 = vmul.f32 -1.442695, %v605_v47 }
 0x666   :  { %v700_v50 = vpop.f32.mrf.mxu0 }
 0x667   :  { %v704_v51 = vadd.f32 %v700_v50, %v186_v49 }
 0x668   :  { %v2075_v52 = vpop.f32.mrf.mxu0 }
 0x669   :  { %2280 = vtanh.f32 %v704_v51  ;;  %v1829_v56 = vmul.f32 -1.442695, %v704_v51 }
 0x66a   :  { %2282 = vpow2.f32 %v1827_v55 }
 0x66b   :  { %2284 = vpow2.f32 %v1829_v56 }
 0x66e   :  { %v2279_v53 = vpop.eup %2278 }
 0x66f   :  { %617 = vrot.lane.b32.xlu0 %v2279_v53, %s2460_s24 }
 0x676   :  { %v2281_v54 = vpop.eup %2280 }
 0x677   :  { %714 = vrot.lane.b32.xlu1 %v2281_v54, %s2460_s24  ;;  %v2283_v57 = vpop.eup %2282 }
 0x678   :  { %v611_v58 = vadd.f32 1.0, %v2283_v57  ;;  %v2285_v59 = vpop.eup %2284 }
 0x679   :  { %v708_v60 = vadd.f32 1.0, %v2285_v59 }
 0x67a   :  { %2286 = vrcp.f32 %v611_v58 }
 0x67b   :  { %2288 = vrcp.f32 %v708_v60 }
 0x687   :  { %v2287_v61 = vpop.eup %2286 }
 0x688   :  { %v2289_v1 = vpop.eup %2288  ;;  %v615_v9 = vmul.f32 %v2287_v61, %v2680_v7 }
 0x689   :  { %v712_v14 = vmul.f32 %v2289_v1, %v2684_v12 }
 0x6e1   :  { %v618_v62 = vpop.permute.xlu0 %617 }
 0x6e2   :  { %v620_v63 = vmul.f32 %v2287_v61, %v618_v62 }
 0x6e4   :  { %622 = vrot.lane.b32.xlu0 %v620_v63, %s2461_s25 }
 0x6e9   :  { %v715_v3 = vpop.permute.xlu1 %714 }
 0x6ea   :  { %v717_v5 = vmul.f32 %v2289_v1, %v715_v3 }
 0x6ec   :  { %719 = vrot.lane.b32.xlu1 %v717_v5, %s2461_s25 }
 0x756   :  { %v623_v11 = vpop.permute.xlu0 %622 }
 0x757   :  { %v2770_v13 = vadd.f32 %v623_v11, %v615_v9 }
 0x759   :  { %2290 = vtanh.f32 %v2770_v13 }
 0x75e   :  { %v720_v15 = vpop.permute.xlu1 %719 }
 0x75f   :  { %v2774_v16 = vadd.f32 %v720_v15, %v712_v14 }
 0x761   :  { %2292 = vtanh.f32 %v2774_v16 }
 0x766   :  { %v2291_v17 = vpop.eup %2290 }
 0x767   :  { %628 = vrot.lane.b32.xlu0 %v2291_v17, %s2460_s24  ;;  %v196_v17 = vadd.f32 %v2561_v10, %v2726_v36 }
 0x76e   :  { %v2293_v18 = vpop.eup %2292 }
 0x76f   :  { %725 = vrot.lane.b32.xlu1 %v2293_v18, %s2460_s24 }
 0x7d9   :  { %v629_v19 = vpop.permute.xlu0 %628 }
 0x7da   :  { %v2779_v7 = vmul.f32 %v2287_v61, %v629_v19 }
 0x7dc   :  { %734 = vrot.lane.b32.xlu1 %v2779_v7, %s2460_s24 }
 0x7e1   :  { %v726_v20 = vpop.permute.xlu1 %725 }
 0x7e2   :  { %v728_v22 = vmul.f32 %v2289_v1, %v726_v20 }
 0x7e4   :  { %730 = vrot.lane.b32.xlu0 %v728_v22, %s2461_s25 }
 0x84e   :  { %v735_v12 = vpop.permute.xlu1 %734 }
 0x856   :  { %v731_v23 = vpop.permute.xlu0 %730 }
 0x857   :  { %v737_v24 = vsel %vm87_vm1, %v731_v23, %v735_v12  ;;  %2104 = vmatmul.mubr.msk.f32.vlgmr.msra.gmra.mxu1 %vm87_vm1, %v731_v23 }
 0x858   :  { %2093 = vmatmul.mubr.msk.f32.vlgmr.msra.gmra.mxu0 %vm331_vm2, %v737_v24  ;;  %2107 = vmatpush3.msra.mxu1 %v2572_v27 }
 0x859   :  { %2108 = vmatprep.subr.mxu1 %v2458_v0  ;;  %2126 = vmatpush3.msra.mxu0 %v2529_v2 }
 0x85a   :  { %2109 = vmatpush3.msra.mxu1 %v2577_v28  ;;  %2127 = vmatprep.subr.mxu0 %v2458_v0 }
 0x85b   :  { %2110 = vmatprep.subr.mxu1 %v2458_v0  ;;  %2128 = vmatpush3.msra.mxu0 %v2532_v4 }
 0x85c   :  { %2111 = vmatpush3.msra.mxu1 %v2585_v29  ;;  %2129 = vmatprep.subr.mxu0 %v2458_v0 }
 0x85d   :  { %2112 = vmatprep.subr.mxu1 %v2458_v0  ;;  %2130 = vmatpush3.msra.mxu0 %v2536_v6 }
 0x85e   :  { %2113 = vmatpush3.msra.mxu1 %v2594_v30  ;;  %2131 = vmatprep.subr.mxu0 %v2458_v0 }
 0x85f   :  { %2114 = vmatprep.subr.mxu1 %v2458_v0  ;;  %2132 = vmatpush3.msra.mxu0 %v2541_v8 }
 0x860   :  { %2115 = vmatpush3.msra.mxu1 %v2603_v31  ;;  %2133 = vmatprep.mubr.msk.f32.mxu0 %vm2459_vm0, %v2458_v0 }
 0x861   :  { %2116 = vmatprep.subr.mxu1 %v2458_v0  ;;  %2122 = vmatprep.mubr.msk.f32.mxu1 %vm2459_vm0, %v2458_v0 }
 0x862   :  { %2117 = vmatpush3.msra.mxu1 %v2612_v32  ;;  %2136 = vmatprep.subr.mxu0 %v2458_v0 }
 0x863   :  { %2118 = vmatprep.subr.mxu1 %v2458_v0 }
 0x864   :  { %2119 = vmatpush3.msra.mxu1 %v2621_v34 }
 0x865   :  { %2120 = vmatprep.subr.mxu1 %v2458_v0 }
 0x866   :  { %2121 = vmatpush3.msra.mxu1 %v2630_v35 }
 0x867   :  { %2155 = vmatprep.subr.mxu1 %v2458_v0 }
 0x917   :  { %v903_v33 = vpop.f32.mrf.mxu1 }
 0x918   :  { %v907_v37 = vadd.f32 %v903_v33, %v191_v25  ;;  %v807_v39 = vpop.f32.mrf.mxu0 }
 0x919   :  { %v808_v40 = vadd.f32 %v2672_v43, %v807_v39  ;;  %v2105_v41 = vpop.f32.mrf.mxu1 }
 0x91a   :  { %2294 = vtanh.f32 %v907_v37  ;;  %v2094_v42 = vpop.f32.mrf.mxu0  ;;  %v1833_v47 = vmul.f32 -1.442695, %v907_v37 }
 0x91b   :  { %2296 = vtanh.f32 %v808_v40  ;;  %v1831_v48 = vmul.f32 -1.442695, %v808_v40 }
 0x91c   :  { %2298 = vpow2.f32 %v1833_v47 }
 0x91d   :  { %2300 = vpow2.f32 %v1831_v48 }
 0x927   :  { %v2295_v45 = vpop.eup %2294 }
 0x928   :  { %v2297_v46 = vpop.eup %2296  ;;  %917 = vrot.lane.b32.xlu1 %v2295_v45, %s2460_s24 }
 0x929   :  { %820 = vrot.lane.b32.xlu0 %v2297_v46, %s2460_s24  ;;  %v2299_v26 = vpop.eup %2298 }
 0x92a   :  { %v2301_v49 = vpop.eup %2300  ;;  %v911_v50 = vadd.f32 1.0, %v2299_v26 }
 0x92b   :  { %v814_v51 = vadd.f32 1.0, %v2301_v49 }
 0x92c   :  { %2302 = vrcp.f32 %v911_v50 }
 0x92d   :  { %2304 = vrcp.f32 %v814_v51 }
 0x939   :  { %v2303_v52 = vpop.eup %2302 }
 0x93a   :  { %v2305_v54 = vpop.eup %2304  ;;  %v915_v58 = vmul.f32 %v2303_v52, %v2774_v16 }
 0x93b   :  { %v818_v60 = vmul.f32 %v2305_v54, %v2770_v13 }
 0x99a   :  { %v918_v53 = vpop.permute.xlu1 %917 }
 0x99b   :  { %v920_v55 = vmul.f32 %v2303_v52, %v918_v53  ;;  %v821_v56 = vpop.permute.xlu0 %820 }
 0x99c   :  { %v823_v57 = vmul.f32 %v2305_v54, %v821_v56 }
 0x99d   :  { %922 = vrot.lane.b32.xlu1 %v920_v55, %s2461_s25 }
 0x99e   :  { %825 = vrot.lane.b32.xlu0 %v823_v57, %s2461_s25 }
 0xa0f   :  { %v923_v59 = vpop.permute.xlu1 %922 }
 0xa10   :  { %v2824_v61 = vadd.f32 %v923_v59, %v915_v58  ;;  %v826_v62 = vpop.permute.xlu0 %825 }
 0xa11   :  { %v2826_v63 = vadd.f32 %v826_v62, %v818_v60 }
 0xa12   :  { %2306 = vtanh.f32 %v2824_v61 }
 0xa13   :  { %2308 = vtanh.f32 %v2826_v63 }
 0xa1f   :  { %v2307_v1 = vpop.eup %2306 }
 0xa20   :  { %v2309_v3 = vpop.eup %2308  ;;  %928 = vrot.lane.b32.xlu1 %v2307_v1, %s2460_s24 }
 0xa21   :  { %831 = vrot.lane.b32.xlu0 %v2309_v3, %s2460_s24 }
 0xa92   :  { %v929_v5 = vpop.permute.xlu1 %928 }
 0xa93   :  { %v931_v9 = vmul.f32 %v2303_v52, %v929_v5  ;;  %v832_v11 = vpop.permute.xlu0 %831 }
 0xa94   :  { %v2832_v14 = vmul.f32 %v2305_v54, %v832_v11 }
 0xa95   :  { %933 = vrot.lane.b32.xlu0 %v931_v9, %s2461_s25 }
 0xa96   :  { %937 = vrot.lane.b32.xlu1 %v2832_v14, %s2460_s24 }
 0xb07   :  { %v934_v13 = vpop.permute.xlu0 %933 }
 0xb08   :  { %v938_v15 = vpop.permute.xlu1 %937  ;;  %2134 = vmatmul.mubr.msk.f32.vlgmr.msra.gmra.mxu0 %vm87_vm1, %v934_v13 }
 0xb09   :  { %v940_v16 = vsel %vm87_vm1, %v934_v13, %v938_v15  ;;  %2137 = vmatpush3.msra.mxu0 %v2572_v27  ;;  %2152 = vmatprep.mubr.msk.f32.mxu0 %vm2459_vm0, %v2458_v0 }
 0xb0a   :  { %2123 = vmatmul.mubr.msk.f32.vlgmr.msra.gmra.mxu1 %vm331_vm2, %v940_v16  ;;  %2138 = vmatprep.subr.mxu0 %v2458_v0 }
 0xb0b   :  { %2139 = vmatpush3.msra.mxu0 %v2577_v28  ;;  %2156 = vmatpush3.msra.mxu1 %v2529_v2 }
 0xb0c   :  { %2140 = vmatprep.subr.mxu0 %v2458_v0  ;;  %2157 = vmatprep.subr.mxu1 %v2458_v0 }
 0xb0d   :  { %2141 = vmatpush3.msra.mxu0 %v2585_v29  ;;  %2158 = vmatpush3.msra.mxu1 %v2532_v4 }
 0xb0e   :  { %2142 = vmatprep.subr.mxu0 %v2458_v0  ;;  %2159 = vmatprep.subr.mxu1 %v2458_v0 }
 0xb0f   :  { %2143 = vmatpush3.msra.mxu0 %v2594_v30  ;;  %2160 = vmatpush3.msra.mxu1 %v2536_v6 }
 0xb10   :  { %2144 = vmatprep.subr.mxu0 %v2458_v0  ;;  %2161 = vmatprep.subr.mxu1 %v2458_v0 }
 0xb11   :  { %2145 = vmatpush3.msra.mxu0 %v2603_v31  ;;  %2162 = vmatpush3.msra.mxu1 %v2541_v8 }
 0xb12   :  { %2146 = vmatprep.subr.mxu0 %v2458_v0  ;;  %2163 = vmatprep.mubr.msk.f32.mxu1 %vm2459_vm0, %v2458_v0 }
 0xb13   :  { %2147 = vmatpush3.msra.mxu0 %v2612_v32  ;;  %2166 = vmatprep.subr.mxu1 %v2458_v0 }
 0xb14   :  { %2148 = vmatprep.subr.mxu0 %v2458_v0 }
 0xb15   :  { %2149 = vmatpush3.msra.mxu0 %v2621_v34 }
 0xb16   :  { %2150 = vmatprep.subr.mxu0 %v2458_v0 }
 0xb17   :  { %2151 = vmatpush3.msra.mxu0 %v2630_v35 }
 0xb18   :  { %2185 = vmatprep.subr.mxu0 %v2458_v0 }
 0xbc8   :  { %v1106_v18 = vpop.f32.mrf.mxu0 }
 0xbc9   :  { %v1110_v19 = vadd.f32 %v1106_v18, %v196_v17 }
 0xbca   :  { %v1010_v20 = vpop.f32.mrf.mxu1  ;;  %v2135_v22 = vpop.f32.mrf.mxu0 }
 0xbcb   :  { %2310 = vtanh.f32 %v1110_v19  ;;  %v1011_v12 = vadd.f32 %v2672_v43, %v1010_v20  ;;  %v1837_v33 = vmul.f32 -1.442695, %v1110_v19 }
 0xbcc   :  { %v2124_v23 = vpop.f32.mrf.mxu1 }
 0xbcd   :  { %2312 = vtanh.f32 %v1011_v12  ;;  %v1835_v37 = vmul.f32 -1.442695, %v1011_v12 }
 0xbce   :  { %2314 = vpow2.f32 %v1837_v33 }
 0xbcf   :  { %2316 = vpow2.f32 %v1835_v37 }
 0xbd8   :  { %v2311_v24 = vpop.eup %2310 }
 0xbd9   :  { %1120 = vrot.lane.b32.xlu1 %v2311_v24, %s2460_s24 }
 0xbda   :  { %v2313_v25 = vpop.eup %2312 }
 0xbdb   :  { %1023 = vrot.lane.b32.xlu0 %v2313_v25, %s2460_s24  ;;  %v2315_v36 = vpop.eup %2314 }
 0xbdc   :  { %v2317_v39 = vpop.eup %2316  ;;  %v1114_v40 = vadd.f32 1.0, %v2315_v36 }
 0xbdd   :  { %v1017_v41 = vadd.f32 1.0, %v2317_v39 }
 0xbde   :  { %2318 = vrcp.f32 %v1114_v40 }
 0xbdf   :  { %2320 = vrcp.f32 %v1017_v41 }
 0xbeb   :  { %v2319_v42 = vpop.eup %2318 }
 0xbec   :  { %v2321_v47 = vpop.eup %2320  ;;  %v1118_v49 = vmul.f32 %v2319_v42, %v2824_v61 }
 0xbed   :  { %v1021_v52 = vmul.f32 %v2321_v47, %v2826_v63 }
 0xc4b   :  { %v1121_v45 = vpop.permute.xlu1 %1120 }
 0xc4c   :  { %v1123_v46 = vmul.f32 %v2319_v42, %v1121_v45 }
 0xc4d   :  { %v1024_v48 = vpop.permute.xlu0 %1023 }
 0xc4e   :  { %1125 = vrot.lane.b32.xlu1 %v1123_v46, %s2461_s25  ;;  %v1026_v26 = vmul.f32 %v2321_v47, %v1024_v48 }
 0xc50   :  { %1028 = vrot.lane.b32.xlu0 %v1026_v26, %s2461_s25 }
 0xcc0   :  { %v1126_v50 = vpop.permute.xlu1 %1125 }
 0xcc1   :  { %v2876_v51 = vadd.f32 %v1126_v50, %v1118_v49 }
 0xcc2   :  { %v1029_v53 = vpop.permute.xlu0 %1028 }
 0xcc3   :  { %2322 = vtanh.f32 %v2876_v51  ;;  %v2880_v54 = vadd.f32 %v1029_v53, %v1021_v52 }
 0xcc5   :  { %2324 = vtanh.f32 %v2880_v54 }
 0xcd0   :  { %v2323_v55 = vpop.eup %2322 }
 0xcd1   :  { %1131 = vrot.lane.b32.xlu1 %v2323_v55, %s2460_s24 }
 0xcd2   :  { %v2325_v56 = vpop.eup %2324 }
 0xcd3   :  { %1034 = vrot.lane.b32.xlu0 %v2325_v56, %s2460_s24 }
 0xd43   :  { %v1132_v57 = vpop.permute.xlu1 %1131 }
 0xd44   :  { %v1134_v58 = vmul.f32 %v2319_v42, %v1132_v57 }
 0xd45   :  { %v1035_v59 = vpop.permute.xlu0 %1034 }
 0xd46   :  { %1136 = vrot.lane.b32.xlu0 %v1134_v58, %s2461_s25  ;;  %v2886_v60 = vmul.f32 %v2321_v47, %v1035_v59 }
 0xd48   :  { %1140 = vrot.lane.b32.xlu1 %v2886_v60, %s2460_s24 }
 0xdb8   :  { %v1137_v61 = vpop.permute.xlu0 %1136 }
 0xdb9   :  { %2164 = vmatmul.mubr.msk.f32.vlgmr.msra.gmra.mxu1 %vm87_vm1, %v1137_v61 }
 0xdba   :  { %2167 = vmatpush3.msra.mxu1 %v2572_v27  ;;  %2182 = vmatprep.mubr.msk.f32.mxu1 %vm2459_vm0, %v2458_v0  ;;  %v1141_v62 = vpop.permute.xlu1 %1140 }
 0xdbb   :  { %2168 = vmatprep.subr.mxu1 %v2458_v0  ;;  %v1143_v63 = vsel %vm87_vm1, %v1137_v61, %v1141_v62 }
 0xdbc   :  { %2169 = vmatpush3.msra.mxu1 %v2577_v28  ;;  %2153 = vmatmul.mubr.msk.f32.vlgmr.msra.gmra.mxu0 %vm331_vm2, %v1143_v63 }
 0xdbd   :  { %2170 = vmatprep.subr.mxu1 %v2458_v0  ;;  %2186 = vmatpush3.msra.mxu0 %v2529_v2  ;;  %v201_v2 = vadd.f32 %v2561_v10, %v2728_v38 }
 0xdbe   :  { %2171 = vmatpush3.msra.mxu1 %v2585_v29  ;;  %2187 = vmatprep.subr.mxu0 %v2458_v0 }
 0xdbf   :  { %2172 = vmatprep.subr.mxu1 %v2458_v0  ;;  %2188 = vmatpush3.msra.mxu0 %v2532_v4 }
 0xdc0   :  { %2173 = vmatpush3.msra.mxu1 %v2594_v30  ;;  %2189 = vmatprep.subr.mxu0 %v2458_v0 }
 0xdc1   :  { %2174 = vmatprep.subr.mxu1 %v2458_v0  ;;  %2190 = vmatpush3.msra.mxu0 %v2536_v6 }
 0xdc2   :  { %2175 = vmatpush3.msra.mxu1 %v2603_v31  ;;  %2191 = vmatprep.subr.mxu0 %v2458_v0 }
 0xdc3   :  { %2176 = vmatprep.subr.mxu1 %v2458_v0  ;;  %2192 = vmatpush3.msra.mxu0 %v2541_v8 }
 0xdc4   :  { %2177 = vmatpush3.msra.mxu1 %v2612_v32  ;;  %2193 = vmatprep.mubr.msk.f32.mxu0 %vm2459_vm0, %v2458_v0 }
 0xdc5   :  { %2178 = vmatprep.subr.mxu1 %v2458_v0  ;;  %2196 = vmatprep.subr.mxu0 %v2458_v0 }
 0xdc6   :  { %2179 = vmatpush3.msra.mxu1 %v2621_v34 }
 0xdc7   :  { %2180 = vmatprep.subr.mxu1 %v2458_v0 }
 0xdc8   :  { %2181 = vmatpush3.msra.mxu1 %v2630_v35 }
 0xdc9   :  { %2215 = vmatprep.subr.mxu1 %v2458_v0 }
 0xe79   :  { %v1309_v4 = vpop.f32.mrf.mxu1 }
 0xe7a   :  { %v1313_v6 = vadd.f32 %v1309_v4, %v201_v2 }
 0xe7b   :  { %v2165_v8 = vpop.f32.mrf.mxu1 }
 0xe7c   :  { %2326 = vtanh.f32 %v1313_v6  ;;  %v1213_v1 = vpop.f32.mrf.mxu0  ;;  %v1841_v13 = vmul.f32 -1.442695, %v1313_v6 }
 0xe7d   :  { %v1214_v3 = vadd.f32 %v2672_v43, %v1213_v1 }
 0xe7e   :  { %v2154_v5 = vpop.f32.mrf.mxu0 }
 0xe7f   :  { %2328 = vtanh.f32 %v1214_v3  ;;  %v1839_v15 = vmul.f32 -1.442695, %v1214_v3 }
 0xe80   :  { %2330 = vpow2.f32 %v1841_v13 }
 0xe81   :  { %2332 = vpow2.f32 %v1839_v15 }
 0xe89   :  { %v2327_v9 = vpop.eup %2326 }
 0xe8a   :  { %1323 = vrot.lane.b32.xlu1 %v2327_v9, %s2460_s24 }
 0xe8c   :  { %v2329_v11 = vpop.eup %2328 }
 0xe8d   :  { %1226 = vrot.lane.b32.xlu0 %v2329_v11, %s2460_s24  ;;  %v2331_v10 = vpop.eup %2330 }
 0xe8e   :  { %v1317_v38 = vadd.f32 1.0, %v2331_v10  ;;  %v2333_v16 = vpop.eup %2332 }
 0xe8f   :  { %v1220_v17 = vadd.f32 1.0, %v2333_v16 }
 0xe90   :  { %2334 = vrcp.f32 %v1317_v38 }
 0xe91   :  { %2336 = vrcp.f32 %v1220_v17 }
 0xe9d   :  { %v2335_v18 = vpop.eup %2334 }
 0xe9e   :  { %v2337_v22 = vpop.eup %2336  ;;  %v1321_v24 = vmul.f32 %v2335_v18, %v2876_v51 }
 0xe9f   :  { %v1224_v37 = vmul.f32 %v2337_v22, %v2880_v54 }
 0xefc   :  { %v1324_v19 = vpop.permute.xlu1 %1323 }
 0xefd   :  { %v1326_v20 = vmul.f32 %v2335_v18, %v1324_v19 }
 0xeff   :  { %1328 = vrot.lane.b32.xlu1 %v1326_v20, %s2461_s25  ;;  %v1227_v12 = vpop.permute.xlu0 %1226 }
 0xf00   :  { %v1229_v23 = vmul.f32 %v2337_v22, %v1227_v12  ;;  %v1650_v12 = vld [vmem:[%s3047_s6 + $0x18] sm:$0xff] }
 0xf02   :  { %1231 = vrot.lane.b32.xlu0 %v1229_v23, %s2461_s25  ;;  %v1649_v23 = vld [vmem:[%s3047_s6 + $0x10] sm:$0xff] }
 0xf71   :  { %v1329_v25 = vpop.permute.xlu1 %1328 }
 0xf72   :  { %v2929_v33 = vadd.f32 %v1329_v25, %v1321_v24 }
 0xf74   :  { %2338 = vtanh.f32 %v2929_v33  ;;  %v1232_v36 = vpop.permute.xlu0 %1231 }
 0xf75   :  { %v2933_v39 = vadd.f32 %v1232_v36, %v1224_v37  ;;  %v1647_v37 = vld [vmem:[%s3047_s6] sm:$0xff] }
 0xf77   :  { %2340 = vtanh.f32 %v2933_v39 }
 0xf81   :  { %v2339_v40 = vpop.eup %2338 }
 0xf82   :  { %1334 = vrot.lane.b32.xlu1 %v2339_v40, %s2460_s24 }
 0xf84   :  { %v2341_v41 = vpop.eup %2340 }
 0xf85   :  { %1237 = vrot.lane.b32.xlu0 %v2341_v41, %s2460_s24 }
 0xff4   :  { %v1335_v42 = vpop.permute.xlu1 %1334 }
 0xff5   :  { %v1337_v45 = vmul.f32 %v2335_v18, %v1335_v42 }
 0xff7   :  { %1339 = vrot.lane.b32.xlu0 %v1337_v45, %s2461_s25  ;;  %v1238_v46 = vpop.permute.xlu0 %1237 }
 0xff8   :  { %v2939_v47 = vmul.f32 %v2337_v22, %v1238_v46 }
 0xffa   :  { %1343 = vrot.lane.b32.xlu1 %v2939_v47, %s2460_s24 }
0x1069   :  { %v1340_v48 = vpop.permute.xlu0 %1339 }
0x106a   :  { %2194 = vmatmul.mubr.msk.f32.vlgmr.msra.gmra.mxu0 %vm87_vm1, %v1340_v48 }
0x106b   :  { %2197 = vmatpush3.msra.mxu0 %v2572_v27  ;;  %2212 = vmatprep.mubr.msk.f32.mxu0 %vm2459_vm0, %v2458_v0  ;;  %v2366_v27 = vld [vmem:[%s3043_s2] ss:$0 sm:$0xff] }
0x106c   :  { %2198 = vmatprep.subr.mxu0 %v2458_v0  ;;  %v1344_v26 = vpop.permute.xlu1 %1343 }
0x106d   :  { %2199 = vmatpush3.msra.mxu0 %v2577_v28  ;;  %v1346_v49 = vsel %vm87_vm1, %v1340_v48, %v1344_v26  ;;  %v206_v28 = vadd.f32 %v2366_v27, %v2761_v44  ;;  %v1848_v27 = vld [vmem:[%s3048_s7] ss:$0 sm:$0xff]  ;;  %s2462_s7 = smov [#allocation8]  }
0x106e   :  { %2200 = vmatprep.subr.mxu0 %v2458_v0  ;;  %2183 = vmatmul.mubr.msk.f32.vlgmr.msra.gmra.mxu1 %vm331_vm2, %v1346_v49 }
0x106f   :  { %2201 = vmatpush3.msra.mxu0 %v2585_v29  ;;  %2223 = vmatprep.mubr.msk.f32.mxu1 %vm2459_vm0, %v2458_v0 }
0x1070   :  { %2202 = vmatprep.subr.mxu0 %v2458_v0  ;;  %2216 = vmatpush3.msra.mxu1 %v1650_v12 }
0x1071   :  { %2203 = vmatpush3.msra.mxu0 %v2594_v30  ;;  %2217 = vmatprep.subr.mxu1 %v2458_v0 }
0x1072   :  { %2204 = vmatprep.subr.mxu0 %v2458_v0  ;;  %2218 = vmatpush3.msra.mxu1 %v1649_v23 }
0x1073   :  { %2205 = vmatpush3.msra.mxu0 %v2603_v31  ;;  %2219 = vmatprep.subr.mxu1 %v2458_v0 }
0x1074   :  { %2206 = vmatprep.subr.mxu0 %v2458_v0 }
0x1075   :  { %2207 = vmatpush3.msra.mxu0 %v2612_v32 }
0x1076   :  { %2208 = vmatprep.subr.mxu0 %v2458_v0 }
0x1077   :  { %2209 = vmatpush3.msra.mxu0 %v2621_v34 }
0x1078   :  { %2210 = vmatprep.subr.mxu0 %v2458_v0 }
0x1079   :  { %2211 = vmatpush3.msra.mxu0 %v2630_v35 }
0x112a   :  { %v1512_v29 = vpop.f32.mrf.mxu0 }
0x112b   :  { %v1516_v30 = vadd.f32 %v1512_v29, %v206_v28 }
0x112c   :  { %v2195_v31 = vpop.f32.mrf.mxu0 }
0x112d   :  { %2342 = vtanh.f32 %v1516_v30  ;;  %v1845_v35 = vmul.f32 -1.442695, %v1516_v30 }
0x112e   :  { %v1416_v50 = vpop.f32.mrf.mxu1 }
0x112f   :  { %v1417_v32 = vadd.f32 %v2672_v43, %v1416_v50 }
0x1130   :  { %v2184_v51 = vpop.f32.mrf.mxu1 }
0x1131   :  { %2344 = vtanh.f32 %v1417_v32  ;;  %v1843_v53 = vmul.f32 -1.442695, %v1417_v32 }
0x1132   :  { %2346 = vpow2.f32 %v1845_v35 }
0x1133   :  { %2348 = vpow2.f32 %v1843_v53 }
0x113a   :  { %v2343_v34 = vpop.eup %2342 }
0x113b   :  { %1526 = vrot.lane.b32.xlu1 %v2343_v34, %s2460_s24 }
0x113e   :  { %v2345_v52 = vpop.eup %2344 }
0x113f   :  { %1429 = vrot.lane.b32.xlu0 %v2345_v52, %s2460_s24  ;;  %v2347_v44 = vpop.eup %2346 }
0x1140   :  { %v1520_v54 = vadd.f32 1.0, %v2347_v44  ;;  %v2349_v55 = vpop.eup %2348 }
0x1141   :  { %v1423_v56 = vadd.f32 1.0, %v2349_v55 }
0x1142   :  { %2350 = vrcp.f32 %v1520_v54 }
0x1143   :  { %2352 = vrcp.f32 %v1423_v56 }
0x114f   :  { %v2351_v57 = vpop.eup %2350 }
0x1150   :  { %v2353_v61 = vpop.eup %2352  ;;  %v1524_v2 = vmul.f32 %v2351_v57, %v2929_v33  ;;  %v1648_v33 = vld [vmem:[%s3047_s6 + $0x8] sm:$0xff] }
0x1151   :  { %v1427_v8 = vmul.f32 %v2353_v61, %v2933_v39  ;;  %2220 = vmatpush3.msra.mxu1 %v1648_v33 }
0x1152   :  { %2221 = vmatprep.subr.mxu1 %v2458_v0 }
0x1153   :  { %2222 = vmatpush3.msra.mxu1 %v1647_v37 }
0x11ad   :  { %v1527_v58 = vpop.permute.xlu1 %1526 }
0x11ae   :  { %v1529_v59 = vmul.f32 %v2351_v57, %v1527_v58 }
0x11b0   :  { %1531 = vrot.lane.b32.xlu1 %v1529_v59, %s2461_s25 }
0x11b1   :  { %v1430_v62 = vpop.permute.xlu0 %1429 }
0x11b2   :  { %v1432_v63 = vmul.f32 %v2353_v61, %v1430_v62 }
0x11b4   :  { %1434 = vrot.lane.b32.xlu0 %v1432_v63, %s2461_s25 }
0x1222   :  { %v1532_v4 = vpop.permute.xlu1 %1531 }
0x1223   :  { %v1534_v6 = vadd.f32 %v1532_v4, %v1524_v2 }
0x1225   :  { %2354 = vtanh.f32 %v1534_v6 }
0x1226   :  { %v1435_v1 = vpop.permute.xlu0 %1434 }
0x1227   :  { %v1437_v3 = vadd.f32 %v1435_v1, %v1427_v8 }
0x1229   :  { %2356 = vtanh.f32 %v1437_v3 }
0x1232   :  { %v2355_v5 = vpop.eup %2354 }
0x1233   :  { %1537 = vrot.lane.b32.xlu1 %v2355_v5, %s2460_s24 }
0x1236   :  { %v2357_v9 = vpop.eup %2356 }
0x1237   :  { %1440 = vrot.lane.b32.xlu0 %v2357_v9, %s2460_s24 }
0x12a5   :  { %v1538_v11 = vpop.permute.xlu1 %1537 }
0x12a6   :  { %v1540_v13 = vmul.f32 %v2351_v57, %v1538_v11 }
0x12a8   :  { %1542 = vrot.lane.b32.xlu0 %v1540_v13, %s2461_s25 }
0x12a9   :  { %v1441_v15 = vpop.permute.xlu0 %1440 }
0x12aa   :  { %v1443_v10 = vmul.f32 %v2353_v61, %v1441_v15 }
0x12ac   :  { %1546 = vrot.lane.b32.xlu1 %v1443_v10, %s2460_s24 }
0x131a   :  { %v1543_v38 = vpop.permute.xlu0 %1542 }
0x131e   :  { %v1547_v16 = vpop.permute.xlu1 %1546 }
0x131f   :  { %v1549_v17 = vsel %vm87_vm1, %v1543_v38, %v1547_v16 }
0x1320   :  { %2213 = vmatmul.mubr.msk.f32.vlgmr.msra.gmra.mxu0 %vm331_vm2, %v1549_v17 }
0x13e0   :  { %v1619_v18 = vpop.f32.mrf.mxu0 }
0x13e1   :  { %v1620_v19 = vadd.f32 %v2672_v43, %v1619_v18 }
0x13e2   :  { %v2214_v20 = vpop.f32.mrf.mxu0 }
0x13e3   :  { %2358 = vtanh.f32 %v1620_v19  ;;  %v1847_v43 = vmul.f32 -1.442695, %v1620_v19 }
0x13e5   :  { %2360 = vpow2.f32 %v1847_v43 }
0x13f0   :  { %v2359_v22 = vpop.eup %2358 }
0x13f1   :  { %1632 = vrot.lane.b32.xlu0 %v2359_v22, %s2460_s24 }
0x13f2   :  { %v2361_v24 = vpop.eup %2360 }
0x13f3   :  { %v1626_v25 = vadd.f32 1.0, %v2361_v24 }
0x13f5   :  { %2362 = vrcp.f32 %v1626_v25 }
0x1402   :  { %v2363_v36 = vpop.eup %2362 }
0x1403   :  { %v1630_v41 = vmul.f32 %v2363_v36, %v1437_v3 }
0x1463   :  { %v1633_v39 = vpop.permute.xlu0 %1632 }
0x1464   :  { %v1635_v40 = vmul.f32 %v2363_v36, %v1633_v39 }
0x1466   :  { %1637 = vrot.lane.b32.xlu1 %v1635_v40, %s2461_s25 }
0x146a   :  { %1659 = vrot.lane.b32.xlu1 %v2719_v21, %s2461_s25 }
0x146e   :  { %1663 = vrot.lane.b32.xlu1 %v2832_v14, %s2461_s25 }
0x1472   :  { %1667 = vrot.lane.b32.xlu1 %v2939_v47, %s2461_s25 }
0x14d8   :  { %v1638_v42 = vpop.permute.xlu1 %1637 }
0x14d9   :  { %v1640_v45 = vadd.f32 %v1638_v42, %v1630_v41 }
0x14db   :  { %2364 = vtanh.f32 %v1640_v45 }
0x14dc   :  { %v1660_v46 = vpop.permute.xlu1 %1659 }
0x14dd   :  { %2224 = vmatmul.mubr.msk.f32.vlgmr.msra.gmra.mxu1 %vm87_vm1, %v1660_v46 }
0x14de   :  { %2226 = vmatprep.mubr.msk.f32.mxu1 %vm2459_vm0, %v2458_v0 }
0x14e0   :  { %v1664_v26 = vpop.permute.xlu1 %1663 }
0x14e8   :  { %v2365_v48 = vpop.eup %2364 }
0x14e9   :  { %1643 = vrot.lane.b32.xlu0 %v2365_v48, %s2460_s24 }
0x14ed   :  { %1661 = vrot.lane.b32.xlu0 %v2779_v7, %s2461_s25 }
0x14f1   :  { %1665 = vrot.lane.b32.xlu0 %v2886_v60, %s2461_s25  ;;  %v1668_v60 = vpop.permute.xlu1 %1667 }
0x14f5   :  { %1669 = vrot.lane.b32.xlu0 %v1443_v10, %s2461_s25 }
0x155b   :  { %v1644_v21 = vpop.permute.xlu0 %1643 }
0x155c   :  { %v1646_v14 = vmul.f32 %v2363_v36, %v1644_v21 }
0x155e   :  { %1671 = vrot.lane.b32.xlu1 %v1646_v14, %s2461_s25  ;;  %s1799_s25 = sshll.u32 %s2462_s7, 4  ;;  %s1800_s25 = int_to_ptr.vmem [resolvable:$true] %s1799_s25 }
0x155f   :  { %v1662_v47 = vpop.permute.xlu0 %1661  ;;  %s2427_s3 = scalar_lea.vmem %s1800_s25, 896  ;;  %p2432_p2 = scmp.lt.s32.totalorder %s1800_s25, %s1800_s25 }
0x1560   :  { %2227 = vmatmul.mubr.msk.f32.gmra.mxu1 %vm87_vm1, %v1662_v47  ;;  %p2428_p1 = scmp.ne.s32.totalorder %s1800_s25, %s2427_s3  ;;  %p2433_p3 = scmp.lt.s32.totalorder %s2427_s3, %s2427_s3 }
0x1561   :  { %2229 = vmatprep.mubr.msk.f32.mxu1 %vm2459_vm0, %v2458_v0 }
0x1562   :  { %p2434_p4 = por %p2433_p3, %p2432_p2 }
0x1563   :  { %v1666_v7 = vpop.permute.xlu0 %1665 }
0x1564   :  { %2230 = vmatmul.mubr.msk.f32.gmra.mxu1 %vm87_vm1, %v1664_v26  ;;  %p2435_p5 = pnand %p2434_p4, %p2428_p1 }
0x1565   :  { %2232 = vmatprep.mubr.msk.f32.mxu1 %vm2459_vm0, %v2458_v0 }
0x1567   :  { %v1670_v49 = vpop.permute.xlu0 %1669 }
0x1568   :  { %2233 = vmatmul.mubr.msk.f32.gmra.mxu1 %vm87_vm1, %v1666_v7 }
0x1569   :  { %2235 = vmatprep.mubr.msk.f32.mxu1 %vm2459_vm0, %v2458_v0 }
0x156c   :  { %2236 = vmatmul.mubr.msk.f32.gmra.mxu1 %vm87_vm1, %v1668_v60 }
0x156d   :  { %2238 = vmatprep.mubr.msk.f32.mxu1 %vm2459_vm0, %v2458_v0 }
0x1570   :  { %2239 = vmatmul.mubr.msk.f32.gmra.mxu1 %vm87_vm1, %v1670_v49 }
0x1571   :  { %2241 = vmatprep.mubr.msk.f32.mxu1 %vm2459_vm0, %v2458_v0 }
0x159d   :  { %v1753_v28 = vpop.f32.mrf.mxu1 }
0x159e   :  { %v1754_v29 = vadd.f32 %v1848_v27, %v1753_v28 }
0x159f   :  { %v2225_v30 = vpop.f32.mrf.mxu1 }
0x15a0   :  { %1787 = vst [vmem:[#allocation8] sm:$0xff] %v1754_v29 }
0x15d0   :  { %v1672_v31 = vpop.permute.xlu1 %1671 }
0x15d1   :  { %2242 = vmatmul.mubr.msk.f32.gmra.mxu1 %vm87_vm1, %v1672_v31 }
0x1620   :  { %v1758_v50 = vpop.f32.mrf.mxu1 }
0x1621   :  { %v1759_v32 = vadd.f32 %v1848_v27, %v1758_v50 }
0x1622   :  { %v2228_v51 = vpop.f32.mrf.mxu1 }
0x1623   :  { %1788 = vst [vmem:[#allocation8 + $0x8] sm:$0xff] %v1759_v32 }
0x1624   :  { %v1763_v34 = vpop.f32.mrf.mxu1 }
0x1625   :  { %v1764_v52 = vadd.f32 %v1848_v27, %v1763_v34 }
0x1626   :  { %v2231_v35 = vpop.f32.mrf.mxu1 }
0x1627   :  { %1789 = vst [vmem:[#allocation8 + $0x10] sm:$0xff] %v1764_v52 }
0x1628   :  { %v1768_v0 = vpop.f32.mrf.mxu1 }
0x1629   :  { %v1769_v53 = vadd.f32 %v1848_v27, %v1768_v0 }
0x162a   :  { %v2234_v44 = vpop.f32.mrf.mxu1 }
0x162b   :  { %1790 = vst [vmem:[#allocation8 + $0x18] sm:$0xff] %v1769_v53 }
0x162c   :  { %v1773_v54 = vpop.f32.mrf.mxu1 }
0x162d   :  { %v1774_v55 = vadd.f32 %v1848_v27, %v1773_v54 }
0x162e   :  { %v2237_v56 = vpop.f32.mrf.mxu1 }
0x162f   :  { %1791 = vst [vmem:[#allocation8 + $0x20] sm:$0xff] %v1774_v55 }
0x1630   :  { %v1778_v57 = vpop.f32.mrf.mxu1 }
0x1631   :  { %v1779_v58 = vadd.f32 %v1848_v27, %v1778_v57 }
0x1632   :  { %v2240_v59 = vpop.f32.mrf.mxu1 }
0x1633   :  { %1792 = vst [vmem:[#allocation8 + $0x28] sm:$0xff] %v1779_v58 }
0x1691   :  { %v1783_v61 = vpop.f32.mrf.mxu1 }
0x1692   :  { %v1784_v62 = vadd.f32 %v1848_v27, %v1783_v61 }
0x1693   :  { %v2243_v63 = vpop.f32.mrf.mxu1 }
0x1694   :  { %1793 = vst [vmem:[#allocation8 + $0x30] sm:$0xff] %v1784_v62 }
0x1695   :  { %2438 = shalt.err (!%p2435_p5)
}
0x1696   :  { %1805 = dma.vmem_to_hbm [thread:$0]  %s1800_s25, 896, %s3049_s8, [#allocation4], %s2455_s10, %s2455_s10, %s2456_s11  }
0x1697   :  { %2451 = dma.done.wait [#allocation4], 896  }
0x1698   :  { %2452 = vsyncadd [#allocation4], 4294966400 }
0x1699   :  { %1809 = vsyncpa [#allocation3], 1 }
0x169a   :  { %1810 = vsyncpa [#allocation6], 1 }
0x169b   :  { %1811 = vsyncpa [#allocation4], 1 }

</bundles_post_ra>
